<compile_context>
chip_gen: v5e
topology: v5e:2x2
jax: 0.10.0
libtpu: 0.0.40
codegen_flags: <defaults>
</compile_context>

<pallas_src>
import math
import jax
import jax.numpy as jnp
from jax.experimental import pallas as pl
from jax.experimental.pallas import tpu as pltpu


def _make_wavefront_lstm_kernel(num_layers, T, B, H):
    """Fused wavefront LSTM kernel.

    Ref order: x_aug, w_proj, w_rec, w_out, b_out, out, adds_scratch.
    """
    L = num_layers
    LH = L * H          # packed hidden/cell state width: [h_0 | ... | h_{L-1}]
    G = 4 * LH          # gate-grouped gates width: [i_* | f_* | g_* | o_*]

    def kernel(x_ref, wproj_ref, wrec_ref, wout_ref, bout_ref, out_ref, adds_ref):
        # --- Hoisted out of the recurrence: input projection + every bias ----
        # adds[t*B:(t+1)*B, :] = [ x_t @ W_ih0 + b0 | b_1 | ... ] in the
        # gate-grouped layout.  One MXU matmul with M = T*B rows; off the
        # serial h-dependency chain.  (If T*B*H ever scales up, chunk this over
        # time — v7x only has 64 MiB VMEM — at these shapes it is 16 KiB.)
        adds_ref[...] = jnp.dot(
            x_ref[...], wproj_ref[...], preferred_element_type=jnp.float32
        )

        # Loop-invariant fused recurrent block matrix, loaded once.
        wrec = wrec_ref[...]                      # (L*H, 4*L*H)

        # Wavefront state lives in vregs (NOT VMEM): no store->load round
        # trips on the recurrence critical path.
        h_all = jnp.zeros((B, LH), jnp.float32)   # [h_0 | h_1 | ...]
        c_all = jnp.zeros((B, LH), jnp.float32)   # [c_0 | c_1 | ...]

        # --- Wavefront (diagonal) schedule over T + L - 1 steps --------------
        # At step s, layer l advances timestep (s - l).  Every active layer
        # only needs state written at step s-1, so all layers share ONE fused
        # matmul per step and the serial chain is T+L-1 steps instead of T*L.
        for s in range(T + L - 1):
            t0 = min(s, T - 1)   # layer-0 timestep (clamped; masked if inactive)

            # One MXU push per wavefront step:
            #   [h_0 | h_1] @ [[W_hh0, W_ih1], [0, W_hh1]]   (gate-grouped cols)
            fused = jnp.dot(h_all, wrec, preferred_element_type=jnp.float32)
            gates = fused + adds_ref[t0 * B:(t0 + 1) * B, :]          # (B, G)

            # Two full-width EUP passes over the whole gates slab; the LH-wide
            # block extracts are static lane slices (XLU, slack).
            sg = jax.nn.sigmoid(gates)
            th = jnp.tanh(gates)
            i_all = sg[:, 0 * LH:1 * LH]
            f_all = sg[:, 1 * LH:2 * LH]
            g_all = th[:, 2 * LH:3 * LH]
            o_all = sg[:, 3 * LH:4 * LH]

            # Vectorized cell update across ALL layers at once.
            c_new = f_all * c_all + i_all * g_all
            h_new = o_all * jnp.tanh(c_new)

            if L - 1 <= s <= T - 1:
                # Interior steps: every layer is active -> plain register carry.
                h_all, c_all = h_new, c_new
            else:
                # Pipeline fill/drain: commit only the active layers' H-blocks.
                # Active layers l satisfy 0 <= s - l <= T-1 (a contiguous
                # range), so the mask is a static lane-range select.
                lo = max(0, s - (T - 1)) * H
                hi = (min(s, L - 1) + 1) * H
                lane = jax.lax.broadcasted_iota(jnp.int32, (B, LH), 1)
                active = (lane >= lo) & (lane < hi)
                h_all = jnp.where(active, h_new, h_all)
                c_all = jnp.where(active, c_new, c_all)

        # --- Fused hidden2tag on the last layer's final hidden state ---------
        # (the only HBM write of the whole forward pass).
        h_last = h_all[:, (L - 1) * H:L * H]
        out_ref[...] = (
            jnp.dot(h_last, wout_ref[...], preferred_element_type=jnp.float32)
            + bout_ref[...]
        ).astype(out_ref.dtype)

    return kernel


def my_lstm_forward(x, params):
    """Pallas forward. x: (B, T, F) batch-first (PyTorch convention)."""
    B, T, F = x.shape
    lstm_layers = params["lstm"]       # [(w_ih_t (Din,4H), w_hh_t (H,4H), b (1,4H)), ...]
    L = len(lstm_layers)
    H = lstm_layers[0][1].shape[0]
    w_out_t, b_out = params["linear"]  # (H, TGT), (1, TGT)
    TGT = w_out_t.shape[1]
    LH = L * H
    G = 4 * LH

    # Time-major, flattened, with a ones column so every bias folds into the
    # single hoisted projection matmul inside the kernel.
    x_tm = jnp.transpose(x, (1, 0, 2)).reshape(T * B, F).astype(jnp.float32)
    x_aug = jnp.concatenate([x_tm, jnp.ones((T * B, 1), jnp.float32)], axis=1)

    # Gate-grouped column layout: columns [g*L*H + l*H, +H) hold gate g of
    # layer l, g in (i, f, g, o) — PyTorch order preserved per layer.
    w_proj = jnp.zeros((F + 1, G), jnp.float32)   # input projection + all biases
    w_rec = jnp.zeros((LH, G), jnp.float32)       # fused recurrent block matrix
    for l, (w_ih_t, w_hh_t, b) in enumerate(lstm_layers):
        b_flat = b.reshape(-1)                    # (4H,), already b_ih + b_hh
        for g in range(4):
            c0 = g * LH + l * H
            w_rec = w_rec.at[l * H:(l + 1) * H, c0:c0 + H].set(
                w_hh_t[:, g * H:(g + 1) * H])
            if l == 0:
                w_proj = w_proj.at[0:F, c0:c0 + H].set(
                    w_ih_t[:, g * H:(g + 1) * H])
            else:
                w_rec = w_rec.at[(l - 1) * H:l * H, c0:c0 + H].set(
                    w_ih_t[:, g * H:(g + 1) * H])
            w_proj = w_proj.at[F, c0:c0 + H].set(b_flat[g * H:(g + 1) * H])

    kernel = _make_wavefront_lstm_kernel(L, T, B, H)

    # Footprint is tens of KiB: keep the grid empty and all operands
    # whole-array in VMEM (no tiling / pipelining needed on any generation).
    # If batch ever scales, add a leading "parallel" grid axis over batch
    # chunks so v7x's 2 TensorCores both get work.
    return pl.pallas_call(
        kernel,
        out_shape=jax.ShapeDtypeStruct((B, TGT), jnp.float32),
        in_specs=[
            pl.BlockSpec(x_aug.shape, lambda: (0, 0)),
            pl.BlockSpec(w_proj.shape, lambda: (0, 0)),
            pl.BlockSpec(w_rec.shape, lambda: (0, 0)),
            pl.BlockSpec(w_out_t.shape, lambda: (0, 0)),
            pl.BlockSpec(b_out.shape, lambda: (0, 0)),
        ],
        out_specs=pl.BlockSpec((B, TGT), lambda: (0, 0)),
        scratch_shapes=[
            pltpu.VMEM((T * B, G), jnp.float32),   # hoisted projection + biases
        ],
        compiler_params=pltpu.CompilerParams(
            vmem_limit_bytes=32 * 1024 * 1024,
        ),
    )(x_aug, w_proj, w_rec, w_out_t, b_out)


def init_params(key, feature_size, hidden_dim, target_size, num_layers):
    """Deterministic init mirroring PyTorch default U(-1/sqrt(H), 1/sqrt(H))."""
    k = 1.0 / math.sqrt(hidden_dim)
    layers = []
    for layer in range(num_layers):
        din = feature_size if layer == 0 else hidden_dim
        key, k1, k2, k3, k4 = jax.random.split(key, 5)
        w_ih = jax.random.uniform(k1, (4 * hidden_dim, din), jnp.float32, -k, k)
        w_hh = jax.random.uniform(k2, (4 * hidden_dim, hidden_dim), jnp.float32, -k, k)
        b_ih = jax.random.uniform(k3, (4 * hidden_dim,), jnp.float32, -k, k)
        b_hh = jax.random.uniform(k4, (4 * hidden_dim,), jnp.float32, -k, k)
        # pre-transpose weights, fold biases together
        layers.append((w_ih.T, w_hh.T, (b_ih + b_hh).reshape(1, -1)))
    key, k5, k6 = jax.random.split(key, 3)
    w_out = jax.random.uniform(k5, (target_size, hidden_dim), jnp.float32, -k, k)
    b_out = jax.random.uniform(k6, (target_size,), jnp.float32, -k, k)
    return {"lstm": layers, "linear": (w_out.T, b_out.reshape(1, -1))}


def ref_forward(x, params):
    """Pure-JAX reference (lax.scan) for correctness check."""
    h_seq = x.astype(jnp.float32)  # (B, T, F)
    B = h_seq.shape[0]
    for (w_ih_t, w_hh_t, b) in params["lstm"]:
        H = w_hh_t.shape[0]

        def step(carry, x_t):
            h, c = carry
            gates = x_t @ w_ih_t + h @ w_hh_t + b[0]
            i = jax.nn.sigmoid(gates[:, :H])
            f = jax.nn.sigmoid(gates[:, H:2 * H])
            g = jnp.tanh(gates[:, 2 * H:3 * H])
            o = jax.nn.sigmoid(gates[:, 3 * H:])
            c = f * c + i * g
            h = o * jnp.tanh(c)
            return (h, c), h

        init = (jnp.zeros((B, H), jnp.float32), jnp.zeros((B, H), jnp.float32))
        _, ys = jax.lax.scan(step, init, jnp.transpose(h_seq, (1, 0, 2)))
        h_seq = jnp.transpose(ys, (1, 0, 2))
    w_out_t, b_out = params["linear"]
    return h_seq[:, -1, :] @ w_out_t + b_out


if __name__ == "__main__":
    # Small shapes consistent with the module: batch=2, seq=8, feature=4,
    # hidden=32, target=4, num_layers=2.
    B, T, F, H, TGT, L = 2, 8, 4, 32, 4, 2

    key = jax.random.PRNGKey(0)
    key, xk = jax.random.split(key)
    x = jax.random.normal(xk, (B, T, F), dtype=jnp.float32)

    params = init_params(key, feature_size=F, hidden_dim=H,
                         target_size=TGT, num_layers=L)

    out = my_lstm_forward(x, params)
    out = jax.block_until_ready(out)

    ref = ref_forward(x, params)
    assert out.shape == (B, TGT), out.shape
    # The fused block matmuls change f32 summation order slightly vs. the
    # reference, so allow a small (still f32-level) tolerance.
    assert jnp.allclose(out, ref, atol=1e-4, rtol=1e-4), (
        f"mismatch: max abs err {jnp.max(jnp.abs(out - ref))}"
    )
    print("KERNEL_OK")
</pallas_src>

<mosaic_0001>
module attributes {stable_mosaic.version = 11 : i64} {
  func.func @kernel(%arg0: memref<16x5xf32, #tpu.memory_space<vmem>>, %arg1: memref<5x256xf32, #tpu.memory_space<vmem>>, %arg2: memref<64x256xf32, #tpu.memory_space<vmem>>, %arg3: memref<32x4xf32, #tpu.memory_space<vmem>>, %arg4: memref<1x4xf32, #tpu.memory_space<vmem>>, %arg5: memref<2x4xf32, #tpu.memory_space<vmem>>, %arg6: memref<16x256xf32, #tpu.memory_space<vmem>>) attributes {dimension_semantics = [], scalar_prefetch = 0 : i64, scratch_operands = 1 : i64, tpu.core_type = #tpu.core_type<tc>} {
    %c0 = arith.constant 0 : index
    %c0_0 = arith.constant 0 : index
    %0 = vector.load %arg0[%c0, %c0_0] : memref<16x5xf32, #tpu.memory_space<vmem>>, vector<16x5xf32>
    %c0_1 = arith.constant 0 : index
    %c0_2 = arith.constant 0 : index
    %1 = vector.load %arg1[%c0_1, %c0_2] : memref<5x256xf32, #tpu.memory_space<vmem>>, vector<5x256xf32>
    %cst = arith.constant dense<0.000000e+00> : vector<16x256xf32>
    %2 = tpu.matmul %0, %1, %cst {dimension_numbers = #tpu.dot_dimension_numbers<[1], [0], [0], [1], [0, 0, 1, 1], [], []>} : vector<16x5xf32>, vector<5x256xf32>, vector<16x256xf32> -> vector<16x256xf32>
    %c0_3 = arith.constant 0 : index
    %c0_4 = arith.constant 0 : index
    %3 = vector.load %arg6[%c0_3, %c0_4] : memref<16x256xf32, #tpu.memory_space<vmem>>, vector<16x256xf32>
    tpu.vector_store %arg6[%c0_3, %c0_4], %2 {strides = array<i32>} : memref<16x256xf32, #tpu.memory_space<vmem>>, vector<16x256xf32>,
    %c0_5 = arith.constant 0 : index
    %c0_6 = arith.constant 0 : index
    %4 = vector.load %arg2[%c0_5, %c0_6] : memref<64x256xf32, #tpu.memory_space<vmem>>, vector<64x256xf32>
    %cst_7 = arith.constant 0.000000e+00 : f32
    %5 = vector.broadcast %cst_7 : f32 to vector<2x64xf32>
    %cst_8 = arith.constant 0.000000e+00 : f32
    %6 = vector.broadcast %cst_8 : f32 to vector<2x64xf32>
    %cst_9 = arith.constant dense<0.000000e+00> : vector<2x256xf32>
    %7 = tpu.matmul %5, %4, %cst_9 {dimension_numbers = #tpu.dot_dimension_numbers<[1], [0], [0], [1], [0, 0, 1, 1], [], []>} : vector<2x64xf32>, vector<64x256xf32>, vector<2x256xf32> -> vector<2x256xf32>
    %c0_10 = arith.constant 0 : index
    %c0_11 = arith.constant 0 : index
    %8 = vector.load %arg6[%c0_10, %c0_11] : memref<16x256xf32, #tpu.memory_space<vmem>>, vector<2x256xf32>
    %9 = arith.addf %7, %8 : vector<2x256xf32>
    %10 = arith.negf %9 : vector<2x256xf32>
    %11 = math.exp %10 : vector<2x256xf32>
    %cst_12 = arith.constant 1.000000e+00 : f32
    %12 = vector.broadcast %cst_12 : f32 to vector<2x256xf32>
    %13 = arith.addf %12, %11 : vector<2x256xf32>
    %14 = arith.divf %12, %13 : vector<2x256xf32>
    %15 = math.tanh %9 : vector<2x256xf32>
    %16 = vector.extract_strided_slice %14 {offsets = [0, 0], sizes = [2, 64], strides = [1, 1]} : vector<2x256xf32> to vector<2x64xf32>
    %17 = vector.extract_strided_slice %14 {offsets = [0, 64], sizes = [2, 64], strides = [1, 1]} : vector<2x256xf32> to vector<2x64xf32>
    %18 = vector.extract_strided_slice %15 {offsets = [0, 128], sizes = [2, 64], strides = [1, 1]} : vector<2x256xf32> to vector<2x64xf32>
    %19 = vector.extract_strided_slice %14 {offsets = [0, 192], sizes = [2, 64], strides = [1, 1]} : vector<2x256xf32> to vector<2x64xf32>
    %20 = arith.mulf %17, %6 : vector<2x64xf32>
    %21 = arith.mulf %16, %18 : vector<2x64xf32>
    %22 = arith.addf %20, %21 : vector<2x64xf32>
    %23 = math.tanh %22 : vector<2x64xf32>
    %24 = arith.mulf %19, %23 : vector<2x64xf32>
    %25 = tpu.iota {dimensions = array<i32: 1>} : vector<2x64xi32>
    %c0_i32 = arith.constant 0 : i32
    %26 = vector.broadcast %c0_i32 : i32 to vector<2x64xi32>
    %27 = arith.cmpi sge, %25, %26 : vector<2x64xi32>
    %c32_i32 = arith.constant 32 : i32
    %28 = vector.broadcast %c32_i32 : i32 to vector<2x64xi32>
    %29 = arith.cmpi slt, %25, %28 : vector<2x64xi32>
    %30 = arith.andi %27, %29 : vector<2x64xi1>
    %31 = arith.select %30, %24, %5 : vector<2x64xi1>, vector<2x64xf32>
    %32 = arith.select %30, %22, %6 : vector<2x64xi1>, vector<2x64xf32>
    %cst_13 = arith.constant dense<0.000000e+00> : vector<2x256xf32>
    %33 = tpu.matmul %31, %4, %cst_13 {dimension_numbers = #tpu.dot_dimension_numbers<[1], [0], [0], [1], [0, 0, 1, 1], [], []>} : vector<2x64xf32>, vector<64x256xf32>, vector<2x256xf32> -> vector<2x256xf32>
    %c2 = arith.constant 2 : index
    %c0_14 = arith.constant 0 : index
    %34 = vector.load %arg6[%c2, %c0_14] : memref<16x256xf32, #tpu.memory_space<vmem>>, vector<2x256xf32>
    %35 = arith.addf %33, %34 : vector<2x256xf32>
    %36 = arith.negf %35 : vector<2x256xf32>
    %37 = math.exp %36 : vector<2x256xf32>
    %cst_15 = arith.constant 1.000000e+00 : f32
    %38 = vector.broadcast %cst_15 : f32 to vector<2x256xf32>
    %39 = arith.addf %38, %37 : vector<2x256xf32>
    %40 = arith.divf %38, %39 : vector<2x256xf32>
    %41 = math.tanh %35 : vector<2x256xf32>
    %42 = vector.extract_strided_slice %40 {offsets = [0, 0], sizes = [2, 64], strides = [1, 1]} : vector<2x256xf32> to vector<2x64xf32>
    %43 = vector.extract_strided_slice %40 {offsets = [0, 64], sizes = [2, 64], strides = [1, 1]} : vector<2x256xf32> to vector<2x64xf32>
    %44 = vector.extract_strided_slice %41 {offsets = [0, 128], sizes = [2, 64], strides = [1, 1]} : vector<2x256xf32> to vector<2x64xf32>
    %45 = vector.extract_strided_slice %40 {offsets = [0, 192], sizes = [2, 64], strides = [1, 1]} : vector<2x256xf32> to vector<2x64xf32>
    %46 = arith.mulf %43, %32 : vector<2x64xf32>
    %47 = arith.mulf %42, %44 : vector<2x64xf32>
    %48 = arith.addf %46, %47 : vector<2x64xf32>
    %49 = math.tanh %48 : vector<2x64xf32>
    %50 = arith.mulf %45, %49 : vector<2x64xf32>
    %cst_16 = arith.constant dense<0.000000e+00> : vector<2x256xf32>
    %51 = tpu.matmul %50, %4, %cst_16 {dimension_numbers = #tpu.dot_dimension_numbers<[1], [0], [0], [1], [0, 0, 1, 1], [], []>} : vector<2x64xf32>, vector<64x256xf32>, vector<2x256xf32> -> vector<2x256xf32>
    %c4 = arith.constant 4 : index
    %c0_17 = arith.constant 0 : index
    %52 = vector.load %arg6[%c4, %c0_17] : memref<16x256xf32, #tpu.memory_space<vmem>>, vector<2x256xf32>
    %53 = arith.addf %51, %52 : vector<2x256xf32>
    %54 = arith.negf %53 : vector<2x256xf32>
    %55 = math.exp %54 : vector<2x256xf32>
    %cst_18 = arith.constant 1.000000e+00 : f32
    %56 = vector.broadcast %cst_18 : f32 to vector<2x256xf32>
    %57 = arith.addf %56, %55 : vector<2x256xf32>
    %58 = arith.divf %56, %57 : vector<2x256xf32>
    %59 = math.tanh %53 : vector<2x256xf32>
    %60 = vector.extract_strided_slice %58 {offsets = [0, 0], sizes = [2, 64], strides = [1, 1]} : vector<2x256xf32> to vector<2x64xf32>
    %61 = vector.extract_strided_slice %58 {offsets = [0, 64], sizes = [2, 64], strides = [1, 1]} : vector<2x256xf32> to vector<2x64xf32>
    %62 = vector.extract_strided_slice %59 {offsets = [0, 128], sizes = [2, 64], strides = [1, 1]} : vector<2x256xf32> to vector<2x64xf32>
    %63 = vector.extract_strided_slice %58 {offsets = [0, 192], sizes = [2, 64], strides = [1, 1]} : vector<2x256xf32> to vector<2x64xf32>
    %64 = arith.mulf %61, %48 : vector<2x64xf32>
    %65 = arith.mulf %60, %62 : vector<2x64xf32>
    %66 = arith.addf %64, %65 : vector<2x64xf32>
    %67 = math.tanh %66 : vector<2x64xf32>
    %68 = arith.mulf %63, %67 : vector<2x64xf32>
    %cst_19 = arith.constant dense<0.000000e+00> : vector<2x256xf32>
    %69 = tpu.matmul %68, %4, %cst_19 {dimension_numbers = #tpu.dot_dimension_numbers<[1], [0], [0], [1], [0, 0, 1, 1], [], []>} : vector<2x64xf32>, vector<64x256xf32>, vector<2x256xf32> -> vector<2x256xf32>
    %c6 = arith.constant 6 : index
    %c0_20 = arith.constant 0 : index
    %70 = vector.load %arg6[%c6, %c0_20] : memref<16x256xf32, #tpu.memory_space<vmem>>, vector<2x256xf32>
    %71 = arith.addf %69, %70 : vector<2x256xf32>
    %72 = arith.negf %71 : vector<2x256xf32>
    %73 = math.exp %72 : vector<2x256xf32>
    %cst_21 = arith.constant 1.000000e+00 : f32
    %74 = vector.broadcast %cst_21 : f32 to vector<2x256xf32>
    %75 = arith.addf %74, %73 : vector<2x256xf32>
    %76 = arith.divf %74, %75 : vector<2x256xf32>
    %77 = math.tanh %71 : vector<2x256xf32>
    %78 = vector.extract_strided_slice %76 {offsets = [0, 0], sizes = [2, 64], strides = [1, 1]} : vector<2x256xf32> to vector<2x64xf32>
    %79 = vector.extract_strided_slice %76 {offsets = [0, 64], sizes = [2, 64], strides = [1, 1]} : vector<2x256xf32> to vector<2x64xf32>
    %80 = vector.extract_strided_slice %77 {offsets = [0, 128], sizes = [2, 64], strides = [1, 1]} : vector<2x256xf32> to vector<2x64xf32>
    %81 = vector.extract_strided_slice %76 {offsets = [0, 192], sizes = [2, 64], strides = [1, 1]} : vector<2x256xf32> to vector<2x64xf32>
    %82 = arith.mulf %79, %66 : vector<2x64xf32>
    %83 = arith.mulf %78, %80 : vector<2x64xf32>
    %84 = arith.addf %82, %83 : vector<2x64xf32>
    %85 = math.tanh %84 : vector<2x64xf32>
    %86 = arith.mulf %81, %85 : vector<2x64xf32>
    %cst_22 = arith.constant dense<0.000000e+00> : vector<2x256xf32>
    %87 = tpu.matmul %86, %4, %cst_22 {dimension_numbers = #tpu.dot_dimension_numbers<[1], [0], [0], [1], [0, 0, 1, 1], [], []>} : vector<2x64xf32>, vector<64x256xf32>, vector<2x256xf32> -> vector<2x256xf32>
    %c8 = arith.constant 8 : index
    %c0_23 = arith.constant 0 : index
    %88 = vector.load %arg6[%c8, %c0_23] : memref<16x256xf32, #tpu.memory_space<vmem>>, vector<2x256xf32>
    %89 = arith.addf %87, %88 : vector<2x256xf32>
    %90 = arith.negf %89 : vector<2x256xf32>
    %91 = math.exp %90 : vector<2x256xf32>
    %cst_24 = arith.constant 1.000000e+00 : f32
    %92 = vector.broadcast %cst_24 : f32 to vector<2x256xf32>
    %93 = arith.addf %92, %91 : vector<2x256xf32>
    %94 = arith.divf %92, %93 : vector<2x256xf32>
    %95 = math.tanh %89 : vector<2x256xf32>
    %96 = vector.extract_strided_slice %94 {offsets = [0, 0], sizes = [2, 64], strides = [1, 1]} : vector<2x256xf32> to vector<2x64xf32>
    %97 = vector.extract_strided_slice %94 {offsets = [0, 64], sizes = [2, 64], strides = [1, 1]} : vector<2x256xf32> to vector<2x64xf32>
    %98 = vector.extract_strided_slice %95 {offsets = [0, 128], sizes = [2, 64], strides = [1, 1]} : vector<2x256xf32> to vector<2x64xf32>
    %99 = vector.extract_strided_slice %94 {offsets = [0, 192], sizes = [2, 64], strides = [1, 1]} : vector<2x256xf32> to vector<2x64xf32>
    %100 = arith.mulf %97, %84 : vector<2x64xf32>
    %101 = arith.mulf %96, %98 : vector<2x64xf32>
    %102 = arith.addf %100, %101 : vector<2x64xf32>
    %103 = math.tanh %102 : vector<2x64xf32>
    %104 = arith.mulf %99, %103 : vector<2x64xf32>
    %cst_25 = arith.constant dense<0.000000e+00> : vector<2x256xf32>
    %105 = tpu.matmul %104, %4, %cst_25 {dimension_numbers = #tpu.dot_dimension_numbers<[1], [0], [0], [1], [0, 0, 1, 1], [], []>} : vector<2x64xf32>, vector<64x256xf32>, vector<2x256xf32> -> vector<2x256xf32>
    %c10 = arith.constant 10 : index
    %c0_26 = arith.constant 0 : index
    %106 = vector.load %arg6[%c10, %c0_26] : memref<16x256xf32, #tpu.memory_space<vmem>>, vector<2x256xf32>
    %107 = arith.addf %105, %106 : vector<2x256xf32>
    %108 = arith.negf %107 : vector<2x256xf32>
    %109 = math.exp %108 : vector<2x256xf32>
    %cst_27 = arith.constant 1.000000e+00 : f32
    %110 = vector.broadcast %cst_27 : f32 to vector<2x256xf32>
    %111 = arith.addf %110, %109 : vector<2x256xf32>
    %112 = arith.divf %110, %111 : vector<2x256xf32>
    %113 = math.tanh %107 : vector<2x256xf32>
    %114 = vector.extract_strided_slice %112 {offsets = [0, 0], sizes = [2, 64], strides = [1, 1]} : vector<2x256xf32> to vector<2x64xf32>
    %115 = vector.extract_strided_slice %112 {offsets = [0, 64], sizes = [2, 64], strides = [1, 1]} : vector<2x256xf32> to vector<2x64xf32>
    %116 = vector.extract_strided_slice %113 {offsets = [0, 128], sizes = [2, 64], strides = [1, 1]} : vector<2x256xf32> to vector<2x64xf32>
    %117 = vector.extract_strided_slice %112 {offsets = [0, 192], sizes = [2, 64], strides = [1, 1]} : vector<2x256xf32> to vector<2x64xf32>
    %118 = arith.mulf %115, %102 : vector<2x64xf32>
    %119 = arith.mulf %114, %116 : vector<2x64xf32>
    %120 = arith.addf %118, %119 : vector<2x64xf32>
    %121 = math.tanh %120 : vector<2x64xf32>
    %122 = arith.mulf %117, %121 : vector<2x64xf32>
    %cst_28 = arith.constant dense<0.000000e+00> : vector<2x256xf32>
    %123 = tpu.matmul %122, %4, %cst_28 {dimension_numbers = #tpu.dot_dimension_numbers<[1], [0], [0], [1], [0, 0, 1, 1], [], []>} : vector<2x64xf32>, vector<64x256xf32>, vector<2x256xf32> -> vector<2x256xf32>
    %c12 = arith.constant 12 : index
    %c0_29 = arith.constant 0 : index
    %124 = vector.load %arg6[%c12, %c0_29] : memref<16x256xf32, #tpu.memory_space<vmem>>, vector<2x256xf32>
    %125 = arith.addf %123, %124 : vector<2x256xf32>
    %126 = arith.negf %125 : vector<2x256xf32>
    %127 = math.exp %126 : vector<2x256xf32>
    %cst_30 = arith.constant 1.000000e+00 : f32
    %128 = vector.broadcast %cst_30 : f32 to vector<2x256xf32>
    %129 = arith.addf %128, %127 : vector<2x256xf32>
    %130 = arith.divf %128, %129 : vector<2x256xf32>
    %131 = math.tanh %125 : vector<2x256xf32>
    %132 = vector.extract_strided_slice %130 {offsets = [0, 0], sizes = [2, 64], strides = [1, 1]} : vector<2x256xf32> to vector<2x64xf32>
    %133 = vector.extract_strided_slice %130 {offsets = [0, 64], sizes = [2, 64], strides = [1, 1]} : vector<2x256xf32> to vector<2x64xf32>
    %134 = vector.extract_strided_slice %131 {offsets = [0, 128], sizes = [2, 64], strides = [1, 1]} : vector<2x256xf32> to vector<2x64xf32>
    %135 = vector.extract_strided_slice %130 {offsets = [0, 192], sizes = [2, 64], strides = [1, 1]} : vector<2x256xf32> to vector<2x64xf32>
    %136 = arith.mulf %133, %120 : vector<2x64xf32>
    %137 = arith.mulf %132, %134 : vector<2x64xf32>
    %138 = arith.addf %136, %137 : vector<2x64xf32>
    %139 = math.tanh %138 : vector<2x64xf32>
    %140 = arith.mulf %135, %139 : vector<2x64xf32>
    %cst_31 = arith.constant dense<0.000000e+00> : vector<2x256xf32>
    %141 = tpu.matmul %140, %4, %cst_31 {dimension_numbers = #tpu.dot_dimension_numbers<[1], [0], [0], [1], [0, 0, 1, 1], [], []>} : vector<2x64xf32>, vector<64x256xf32>, vector<2x256xf32> -> vector<2x256xf32>
    %c14 = arith.constant 14 : index
    %c0_32 = arith.constant 0 : index
    %142 = vector.load %arg6[%c14, %c0_32] : memref<16x256xf32, #tpu.memory_space<vmem>>, vector<2x256xf32>
    %143 = arith.addf %141, %142 : vector<2x256xf32>
    %144 = arith.negf %143 : vector<2x256xf32>
    %145 = math.exp %144 : vector<2x256xf32>
    %cst_33 = arith.constant 1.000000e+00 : f32
    %146 = vector.broadcast %cst_33 : f32 to vector<2x256xf32>
    %147 = arith.addf %146, %145 : vector<2x256xf32>
    %148 = arith.divf %146, %147 : vector<2x256xf32>
    %149 = math.tanh %143 : vector<2x256xf32>
    %150 = vector.extract_strided_slice %148 {offsets = [0, 0], sizes = [2, 64], strides = [1, 1]} : vector<2x256xf32> to vector<2x64xf32>
    %151 = vector.extract_strided_slice %148 {offsets = [0, 64], sizes = [2, 64], strides = [1, 1]} : vector<2x256xf32> to vector<2x64xf32>
    %152 = vector.extract_strided_slice %149 {offsets = [0, 128], sizes = [2, 64], strides = [1, 1]} : vector<2x256xf32> to vector<2x64xf32>
    %153 = vector.extract_strided_slice %148 {offsets = [0, 192], sizes = [2, 64], strides = [1, 1]} : vector<2x256xf32> to vector<2x64xf32>
    %154 = arith.mulf %151, %138 : vector<2x64xf32>
    %155 = arith.mulf %150, %152 : vector<2x64xf32>
    %156 = arith.addf %154, %155 : vector<2x64xf32>
    %157 = math.tanh %156 : vector<2x64xf32>
    %158 = arith.mulf %153, %157 : vector<2x64xf32>
    %cst_34 = arith.constant dense<0.000000e+00> : vector<2x256xf32>
    %159 = tpu.matmul %158, %4, %cst_34 {dimension_numbers = #tpu.dot_dimension_numbers<[1], [0], [0], [1], [0, 0, 1, 1], [], []>} : vector<2x64xf32>, vector<64x256xf32>, vector<2x256xf32> -> vector<2x256xf32>
    %c14_35 = arith.constant 14 : index
    %c0_36 = arith.constant 0 : index
    %160 = vector.load %arg6[%c14_35, %c0_36] : memref<16x256xf32, #tpu.memory_space<vmem>>, vector<2x256xf32>
    %161 = arith.addf %159, %160 : vector<2x256xf32>
    %162 = arith.negf %161 : vector<2x256xf32>
    %163 = math.exp %162 : vector<2x256xf32>
    %cst_37 = arith.constant 1.000000e+00 : f32
    %164 = vector.broadcast %cst_37 : f32 to vector<2x256xf32>
    %165 = arith.addf %164, %163 : vector<2x256xf32>
    %166 = arith.divf %164, %165 : vector<2x256xf32>
    %167 = math.tanh %161 : vector<2x256xf32>
    %168 = vector.extract_strided_slice %166 {offsets = [0, 0], sizes = [2, 64], strides = [1, 1]} : vector<2x256xf32> to vector<2x64xf32>
    %169 = vector.extract_strided_slice %166 {offsets = [0, 64], sizes = [2, 64], strides = [1, 1]} : vector<2x256xf32> to vector<2x64xf32>
    %170 = vector.extract_strided_slice %167 {offsets = [0, 128], sizes = [2, 64], strides = [1, 1]} : vector<2x256xf32> to vector<2x64xf32>
    %171 = vector.extract_strided_slice %166 {offsets = [0, 192], sizes = [2, 64], strides = [1, 1]} : vector<2x256xf32> to vector<2x64xf32>
    %172 = arith.mulf %169, %156 : vector<2x64xf32>
    %173 = arith.mulf %168, %170 : vector<2x64xf32>
    %174 = arith.addf %172, %173 : vector<2x64xf32>
    %175 = math.tanh %174 : vector<2x64xf32>
    %176 = arith.mulf %171, %175 : vector<2x64xf32>
    %177 = tpu.iota {dimensions = array<i32: 1>} : vector<2x64xi32>
    %c32_i32_38 = arith.constant 32 : i32
    %178 = vector.broadcast %c32_i32_38 : i32 to vector<2x64xi32>
    %179 = arith.cmpi sge, %177, %178 : vector<2x64xi32>
    %c64_i32 = arith.constant 64 : i32
    %180 = vector.broadcast %c64_i32 : i32 to vector<2x64xi32>
    %181 = arith.cmpi slt, %177, %180 : vector<2x64xi32>
    %182 = arith.andi %179, %181 : vector<2x64xi1>
    %183 = arith.select %182, %176, %158 : vector<2x64xi1>, vector<2x64xf32>
    %184 = vector.extract_strided_slice %183 {offsets = [0, 32], sizes = [2, 32], strides = [1, 1]} : vector<2x64xf32> to vector<2x32xf32>
    %c0_39 = arith.constant 0 : index
    %c0_40 = arith.constant 0 : index
    %185 = vector.load %arg3[%c0_39, %c0_40] : memref<32x4xf32, #tpu.memory_space<vmem>>, vector<32x4xf32>
    %cst_41 = arith.constant dense<0.000000e+00> : vector<2x4xf32>
    %186 = tpu.matmul %184, %185, %cst_41 {dimension_numbers = #tpu.dot_dimension_numbers<[1], [0], [0], [1], [0, 0, 1, 1], [], []>} : vector<2x32xf32>, vector<32x4xf32>, vector<2x4xf32> -> vector<2x4xf32>
    %c0_42 = arith.constant 0 : index
    %c0_43 = arith.constant 0 : index
    %187 = vector.load %arg4[%c0_42, %c0_43] : memref<1x4xf32, #tpu.memory_space<vmem>>, vector<1x4xf32>
    %188 = vector.broadcast %187 : vector<1x4xf32> to vector<2x4xf32>
    %189 = arith.addf %186, %188 : vector<2x4xf32>
    %c0_44 = arith.constant 0 : index
    %c0_45 = arith.constant 0 : index
    %190 = vector.load %arg5[%c0_44, %c0_45] : memref<2x4xf32, #tpu.memory_space<vmem>>, vector<2x4xf32>
    tpu.vector_store %arg5[%c0_44, %c0_45], %189 {strides = array<i32>} : memref<2x4xf32, #tpu.memory_space<vmem>>, vector<2x4xf32>,
    return
  }
}

</mosaic_0001>

<bundles_post_ra>
// kernel: tpu_custom_call.1
= control target key start
LH: loop header
LB: loop body
LE: loop exit
PB: predicated region body
PF: predicated region fallthrough
CT: control target
= control target key end

     0   :  { %10 = vsyncpa [#allocation4], 0  ;;  %s1607_s0 = inlined_call_operand.vmem [shape: f32[16,5], index: 0, kind: input, shape index: {}]   ;;  %s1608_s1 = inlined_call_operand.vmem [shape: f32[5,256], index: 1, kind: input, shape index: {}]   ;;  %s1609_s2 = inlined_call_operand.hbm [shape: f32[64,256], index: 2, kind: input, shape index: {}]   ;;  %s1610_s3 = inlined_call_operand.vmem [shape: f32[32,4], index: 3, kind: input, shape index: {}]   ;;  %s1611_s4 = inlined_call_operand.vmem [shape: f32[1,4], index: 4, kind: input, shape index: {}]   ;;  %s1612_s5 = inlined_call_operand.hbm [shape: f32[2,4], index: 5, kind: output, shape index: {}]  }
   0x1   :  { %11 = vsyncpa [#allocation5], 0  ;;  %s20_s20 = sshll.u32 %s1609_s2, 4  ;;  %s1297_s21 = smov [#allocation3]   ;;  %s21_s20 = int_to_ptr.hbm [resolvable:$true] %s20_s20 }
   0x2   :  { %s22_s22 = sshll.u32 %s1297_s21, 4  ;;  %s1298_s23 = smov 256   ;;  %s23_s22 = int_to_ptr.vmem [resolvable:$true] %s22_s22 }
   0x3   :  { %s1299_s24 = smov 16  }
   0x4   :  { %28 = dma.hbm_to_vmem [thread:$0]  %s21_s20, 2048, %s23_s22, [#allocation4], %s1298_s23, %s1298_s23, %s1299_s24  }
   0x5   :  { %1293 = dma.done.wait [#allocation4], 2048  }
   0x6   :  { %1294 = vsyncadd [#allocation4], 4294965248  ;;  %v1337_v0 = vld [vmem:[#allocation3 + $0x70] sm:$0xff]  ;;  %v1339_v1 = vld [vmem:[#allocation3 + $0x60] sm:$0xff]  ;;  %vm48_vm0 = vcmask 1044480   ;;  %vm41_vm1 = vcmask 39936   ;;  %v215_v62 = vlaneseq }
   0x7   :  { %135 = vmatpush.msra.mxu2 %v1337_v0  ;;  %v1342_v2 = vld [vmem:[#allocation3 + $0x78] sm:$0xff]  ;;  %v1344_v3 = vld [vmem:[#allocation3 + $0x50] sm:$0xff]  ;;  %v1347_v4 = vld [vmem:[#allocation3 + $0x68] sm:$0xff]  ;;  %v1300_v19 = vmov 0.0   ;;  %vm123_vm11 = vcmask 523264   ;;  %s1302_s14 = smov 96  }
   0x8   :  { %155 = vmatpush.msra.mxu3 %v1342_v2  ;;  %v39_v5 = vld [vmem:[%s1608_s1] sm:$0x1f]  ;;  %v1354_v6 = vld [vmem:[#allocation3 + $0x58] sm:$0xff]  ;;  %v1364_v9 = vld [vmem:[#allocation3 + $0x48] sm:$0xff]  ;;  %v1470_v63 = vand.u32 127, %v215_v62  ;;  %s1078_s20 = sshll.u32 %s1612_s5, 4  ;;  %s1079_s20 = int_to_ptr.hbm [resolvable:$true] %s1078_s20 }
   0x9   :  { %136 = vmatpush.msra.mxu2 %v1339_v1  ;;  %1088 = vmatpush.msk.msra.mxu0 %vm48_vm0, %v39_v5  ;;  %v37_v7 = vld [vmem:[%s1607_s0] sm:$0xff]  ;;  %v40_v10 = vld [vmem:[%s1608_s1 + $0x8] sm:$0x1f]  ;;  %v1370_v11 = vld [vmem:[#allocation3 + $0x30] sm:$0xff]  ;;  %s1301_s1 = smov 64  }
   0xa   :  { %v1359_v8 = vld [vmem:[#allocation3 + $0x40] sm:$0xff]  ;;  %156 = vmatpush.msra.mxu3 %v1347_v4  ;;  %1089 = vmatmul.msk.f32.vlgmr.msra.gmra.mxu0 %vm41_vm1, %v37_v7  ;;  %v1375_v12 = vld [vmem:[#allocation3 + $0x38] sm:$0xff]  ;;  %v1383_v14 = vld [vmem:[#allocation3 + $0x28] sm:$0xff]  ;;  %vm218_vm10 = vcmp.lt.s32.totalorder %v1470_v63, 32 }
   0xb   :  { %137 = vmatpush.msra.mxu2 %v1344_v3  ;;  %249 = vmatpush.msrb.mxu0 %v1337_v0  ;;  %v1378_v13 = vld [vmem:[#allocation3 + $0x20] sm:$0xff]  ;;  %v1386_v15 = vld [vmem:[#allocation3 + $0x10] sm:$0xff]  ;;  %v1391_v16 = vld [vmem:[#allocation3 + $0x18] sm:$0xff] }
   0xc   :  { %157 = vmatpush.msra.mxu3 %v1354_v6  ;;  %1091 = vmatpush.msk.msra.mxu1 %vm48_vm0, %v40_v10  ;;  %v1394_v17 = vld [vmem:[#allocation3] sm:$0xff]  ;;  %v1399_v18 = vld [vmem:[#allocation3 + $0x8] sm:$0xff] }
   0xd   :  { %138 = vmatpush.msra.mxu2 %v1359_v8  ;;  %1092 = vmatmul.msk.f32.vlgmr.msra.gmra.mxu1 %vm41_vm1, %v37_v7  ;;  %v38_v61 = vld [vmem:[%s1607_s0 + $0x8] sm:$0xff] }
   0xe   :  { %158 = vmatpush.msra.mxu3 %v1364_v9  ;;  %269 = vmatpush.msrb.mxu1 %v1342_v2 }
   0xf   :  { %139 = vmatpush.msra.mxu2 %v1370_v11  ;;  %250 = vmatpush.msrb.mxu0 %v1339_v1 }
  0x10   :  { %159 = vmatpush.msra.mxu3 %v1375_v12  ;;  %270 = vmatpush.msrb.mxu1 %v1347_v4 }
  0x11   :  { %140 = vmatpush.msra.mxu2 %v1378_v13  ;;  %251 = vmatpush.msrb.mxu0 %v1344_v3 }
  0x12   :  { %160 = vmatpush.msra.mxu3 %v1383_v14  ;;  %271 = vmatpush.msrb.mxu1 %v1354_v6 }
  0x13   :  { %141 = vmatpush.msra.mxu2 %v1386_v15  ;;  %252 = vmatpush.msrb.mxu0 %v1359_v8 }
  0x14   :  { %161 = vmatpush.msra.mxu3 %v1391_v16  ;;  %272 = vmatpush.msrb.mxu1 %v1364_v9 }
  0x15   :  { %142 = vmatpush.msra.mxu2 %v1394_v17  ;;  %253 = vmatpush.msrb.mxu0 %v1370_v11 }
  0x16   :  { %143 = vmatmul.f32.vlgmr.msra.gmra.mxu2 %v1300_v19  ;;  %162 = vmatpush.msra.mxu3 %v1399_v18 }
  0x17   :  { %163 = vmatmul.f32.vlgmr.msra.gmra.mxu3 %v1300_v19  ;;  %273 = vmatpush.msrb.mxu1 %v1375_v12 }
  0x18   :  { %254 = vmatpush.msrb.mxu0 %v1378_v13  ;;  %354 = vmatpush.msrb.mxu2 %v1337_v0 }
  0x19   :  { %274 = vmatpush.msrb.mxu1 %v1383_v14  ;;  %374 = vmatpush.msrb.mxu3 %v1342_v2 }
  0x1a   :  { %255 = vmatpush.msrb.mxu0 %v1386_v15  ;;  %355 = vmatpush.msrb.mxu2 %v1339_v1 }
  0x1b   :  { %275 = vmatpush.msrb.mxu1 %v1391_v16  ;;  %375 = vmatpush.msrb.mxu3 %v1347_v4 }
  0x1c   :  { %256 = vmatpush.msrb.mxu0 %v1394_v17  ;;  %356 = vmatpush.msrb.mxu2 %v1344_v3 }
  0x1d   :  { %276 = vmatpush.msrb.mxu1 %v1399_v18  ;;  %376 = vmatpush.msrb.mxu3 %v1354_v6 }
  0x1e   :  { %357 = vmatpush.msrb.mxu2 %v1359_v8  ;;  %455 = vmatpush.msra.mxu0 %v1337_v0 }
  0x1f   :  { %377 = vmatpush.msrb.mxu3 %v1364_v9  ;;  %475 = vmatpush.msra.mxu1 %v1342_v2 }
  0x20   :  { %358 = vmatpush.msrb.mxu2 %v1370_v11  ;;  %456 = vmatpush.msra.mxu0 %v1339_v1 }
  0x21   :  { %378 = vmatpush.msrb.mxu3 %v1375_v12  ;;  %476 = vmatpush.msra.mxu1 %v1347_v4 }
  0x22   :  { %359 = vmatpush.msrb.mxu2 %v1378_v13  ;;  %457 = vmatpush.msra.mxu0 %v1344_v3 }
  0x23   :  { %379 = vmatpush.msrb.mxu3 %v1383_v14  ;;  %477 = vmatpush.msra.mxu1 %v1354_v6 }
  0x24   :  { %360 = vmatpush.msrb.mxu2 %v1386_v15  ;;  %458 = vmatpush.msra.mxu0 %v1359_v8 }
  0x25   :  { %380 = vmatpush.msrb.mxu3 %v1391_v16  ;;  %478 = vmatpush.msra.mxu1 %v1364_v9 }
  0x26   :  { %361 = vmatpush.msrb.mxu2 %v1394_v17  ;;  %459 = vmatpush.msra.mxu0 %v1370_v11 }
  0x27   :  { %381 = vmatpush.msrb.mxu3 %v1399_v18  ;;  %479 = vmatpush.msra.mxu1 %v1375_v12 }
  0x28   :  { %460 = vmatpush.msra.mxu0 %v1378_v13  ;;  %550 = vmatpush.msra.mxu2 %v1337_v0 }
  0x29   :  { %480 = vmatpush.msra.mxu1 %v1383_v14  ;;  %570 = vmatpush.msra.mxu3 %v1342_v2 }
  0x2a   :  { %461 = vmatpush.msra.mxu0 %v1386_v15  ;;  %551 = vmatpush.msra.mxu2 %v1339_v1 }
  0x2b   :  { %481 = vmatpush.msra.mxu1 %v1391_v16  ;;  %571 = vmatpush.msra.mxu3 %v1347_v4 }
  0x2c   :  { %462 = vmatpush.msra.mxu0 %v1394_v17  ;;  %552 = vmatpush.msra.mxu2 %v1344_v3 }
  0x2d   :  { %482 = vmatpush.msra.mxu1 %v1399_v18  ;;  %572 = vmatpush.msra.mxu3 %v1354_v6 }
  0x2e   :  { %553 = vmatpush.msra.mxu2 %v1359_v8  ;;  %1090 = vmatmul.msk.f32.gmra.mxu0 %vm41_vm1, %v38_v61 }
  0x2f   :  { %573 = vmatpush.msra.mxu3 %v1364_v9  ;;  %1093 = vmatmul.msk.f32.gmra.mxu1 %vm41_vm1, %v38_v61 }
  0x30   :  { %554 = vmatpush.msra.mxu2 %v1370_v11 }
  0x31   :  { %574 = vmatpush.msra.mxu3 %v1375_v12 }
  0x32   :  { %555 = vmatpush.msra.mxu2 %v1378_v13 }
  0x33   :  { %575 = vmatpush.msra.mxu3 %v1383_v14 }
  0x34   :  { %556 = vmatpush.msra.mxu2 %v1386_v15 }
  0x35   :  { %576 = vmatpush.msra.mxu3 %v1391_v16 }
  0x36   :  { %557 = vmatpush.msra.mxu2 %v1394_v17 }
  0x37   :  { %577 = vmatpush.msra.mxu3 %v1399_v18 }
  0x87   :  { %v72_v20 = vpop.f32.mrf.mxu0 }
  0x88   :  { %101 = vst [vmem:[#allocation2 + $0x10] sm:$0xff] %v72_v20 }
  0x8a   :  { %v95_v21 = vpop.f32.mrf.mxu1 }
  0x8b   :  { %102 = vst [vmem:[#allocation2] sm:$0xff] %v95_v21 }
  0x8f   :  { %v121_v22 = vld [vmem:[#allocation2 + $0x10] sm:$0x3] }
  0x92   :  { %v122_v28 = vld [vmem:[#allocation2] sm:$0x3] }
  0x99   :  { %v144_v23 = vpop.f32.mrf.mxu2 }
  0x9a   :  { %v145_v24 = vadd.f32 %v144_v23, %v121_v22  ;;  %v164_v29 = vpop.f32.mrf.mxu3  ;;  %v230_v22 = vld [vmem:[#allocation2 + $0x10] sm:$0xc] }
  0x9b   :  { %v165_v31 = vadd.f32 %v164_v29, %v122_v28  ;;  %v234_v23 = vrot.slane %v230_v22, 2  ;;  %v231_v29 = vld [vmem:[#allocation2] sm:$0xc] }
  0x9c   :  { %v1094_v25 = vmul.f32 -1.442695, %v145_v24 }
  0x9d   :  { %v1095_v43 = vmul.f32 -1.442695, %v165_v31 }
  0x9e   :  { %1137 = vpow2.f32 %v1094_v25 }
  0xa4   :  { %v1138_v26 = vpop.eup %1137 }
  0xa5   :  { %v173_v27 = vadd.f32 1.0, %v1138_v26 }
  0xa7   :  { %1139 = vrcp.f32 %v173_v27  ;;  %v186_v34 = vand.u32 2147483648, %v173_v27  ;;  %v184_v36 = vand.u32 2147483647, %v173_v27  ;;  %vm180_vm3 = vweird.f32 %v173_v27 }
  0xa8   :  { %1141 = vtanh.f32 %v165_v31  ;;  %v235_v31 = vrot.slane %v231_v29, 2 }
  0xa9   :  { %v187_v39 = vor.u32 1.1754944e-38, %v186_v34  ;;  %vm185_vm5 = vcmp.eq.f32.partialorder %v184_v36, 8.507059e+37  ;;  %1143 = vpow2.f32 %v1095_v43 }
  0xab   :  { %v75_v20 = vpop.f32.mrf.mxu0 }
  0xac   :  { %103 = vst [vmem:[#allocation2 + $0x18] sm:$0xff] %v75_v20  ;;  %v98_v21 = vpop.f32.mrf.mxu1 }
  0xad   :  { %v1140_v30 = vpop.eup %1139  ;;  %104 = vst [vmem:[#allocation2 + $0x8] sm:$0xff] %v98_v21 }
  0xae   :  { %v176_v32 = vmul.f32 %v1140_v30, %v173_v27  ;;  %vm181_vm2 = vweird.f32 %v1140_v30  ;;  %v1142_v38 = vpop.eup %1141 }
  0xaf   :  { %vm182_vm4 = vmor %vm180_vm3, %vm181_vm2  ;;  %v1144_v44 = vpop.eup %1143 }
  0xb0   :  { %v177_v33 = vsub.f32 1.0, %v176_v32  ;;  %v174_v45 = vadd.f32 1.0, %v1144_v44 }
  0xb2   :  { %v178_v35 = vmul.f32 %v1140_v30, %v177_v33  ;;  %1145 = vrcp.f32 %v174_v45  ;;  %vm195_vm6 = vweird.f32 %v174_v45  ;;  %v201_v53 = vand.u32 2147483648, %v174_v45 }
  0xb3   :  { %v199_v55 = vand.u32 2147483647, %v174_v45 }
  0xb4   :  { %v179_v37 = vadd.f32 %v1140_v30, %v178_v35  ;;  %v202_v56 = vor.u32 1.1754944e-38, %v201_v53 }
  0xb5   :  { %vm200_vm9 = vcmp.eq.f32.partialorder %v199_v55, 8.507059e+37 }
  0xb6   :  { %v183_v40 = vsel %vm182_vm4, %v1140_v30, %v179_v37 }
  0xb7   :  { %v188_v41 = vsel %vm185_vm5, %v187_v39, %v183_v40 }
  0xb8   :  { %v207_v42 = vmul.f32 %v1142_v38, %v188_v41  ;;  %v1146_v46 = vpop.eup %1145  ;;  %v206_v50 = vmul.f32 0.0, %v188_v41 }
  0xb9   :  { %v191_v47 = vmul.f32 %v1146_v46, %v174_v45  ;;  %vm196_vm7 = vweird.f32 %v1146_v46 }
  0xba   :  { %209 = vrot.lane.b32.xlu0 %v207_v42, %s1301_s1  ;;  %vm197_vm8 = vmor %vm195_vm6, %vm196_vm7 }
  0xbb   :  { %v192_v48 = vsub.f32 1.0, %v191_v47 }
  0xbd   :  { %v193_v49 = vmul.f32 %v1146_v46, %v192_v48 }
  0xbf   :  { %v194_v54 = vadd.f32 %v1146_v46, %v193_v49 }
  0xc1   :  { %v198_v57 = vsel %vm197_vm8, %v1146_v46, %v194_v54 }
  0xc2   :  { %v203_v59 = vsel %vm200_vm9, %v202_v56, %v198_v57 }
 0x12c   :  { %v210_v51 = vpop.permute.xlu0 %209 }
 0x12d   :  { %v212_v52 = vadd.f32 %v210_v51, %v206_v50 }
 0x12f   :  { %1147 = vtanh.f32 %v212_v52  ;;  %226 = vrot.lane.b32.xlu1 %v212_v52, %s1301_s1 }
 0x135   :  { %v1148_v58 = vpop.eup %1147 }
 0x136   :  { %v214_v60 = vmul.f32 %v1148_v58, %v203_v59 }
 0x138   :  { %221 = vrot.lane.b32.xlu0 %v214_v60, %s1301_s1 }
 0x1a1   :  { %v227_v5 = vpop.permute.xlu1 %226 }
 0x1a2   :  { %v229_v7 = vsel %vm218_vm10, %v227_v5, 0.0 }
 0x1a3   :  { %321 = vrot.lane.b32.xlu1 %v229_v7, %s1301_s1 }
 0x1aa   :  { %v222_v10 = vpop.permute.xlu0 %221 }
 0x1ab   :  { %v224_v19 = vsel %vm218_vm10, %v222_v10, 0.0  ;;  %v333_v10 = vld [vmem:[#allocation2 + $0x10] sm:$0x30] }
 0x1ac   :  { %1096 = vmatmul.msk.f32.vlgmr.msrb.gmra.mxu0 %vm123_vm11, %v224_v19  ;;  %1097 = vmatmul.msk.f32.vlgmr.msrb.gmra.mxu1 %vm123_vm11, %v224_v19  ;;  %v340_v19 = vrot.slane %v333_v10, 4 }
 0x1ad   :  { %651 = vmatpush.msrb.mxu0 %v1337_v0  ;;  %671 = vmatpush.msrb.mxu1 %v1342_v2 }
 0x1af   :  { %652 = vmatpush.msrb.mxu0 %v1339_v1  ;;  %672 = vmatpush.msrb.mxu1 %v1347_v4 }
 0x1b1   :  { %653 = vmatpush.msrb.mxu0 %v1344_v3  ;;  %673 = vmatpush.msrb.mxu1 %v1354_v6 }
 0x1b3   :  { %654 = vmatpush.msrb.mxu0 %v1359_v8  ;;  %674 = vmatpush.msrb.mxu1 %v1364_v9 }
 0x1b5   :  { %655 = vmatpush.msrb.mxu0 %v1370_v11  ;;  %675 = vmatpush.msrb.mxu1 %v1375_v12 }
 0x1b7   :  { %656 = vmatpush.msrb.mxu0 %v1378_v13  ;;  %676 = vmatpush.msrb.mxu1 %v1383_v14 }
 0x1b9   :  { %657 = vmatpush.msrb.mxu0 %v1386_v15  ;;  %677 = vmatpush.msrb.mxu1 %v1391_v16 }
 0x1bb   :  { %658 = vmatpush.msrb.mxu0 %v1394_v17  ;;  %678 = vmatpush.msrb.mxu1 %v1399_v18 }
 0x215   :  { %v322_v51 = vpop.permute.xlu1 %321 }
 0x229   :  { %v258_v24 = vpop.f32.mrf.mxu0  ;;  %v278_v30 = vpop.f32.mrf.mxu1 }
 0x22a   :  { %v259_v25 = vadd.f32 %v258_v24, %v234_v23  ;;  %v279_v33 = vadd.f32 %v278_v30, %v235_v31 }
 0x22c   :  { %v1098_v26 = vmul.f32 -1.442695, %v259_v25  ;;  %v1099_v45 = vmul.f32 -1.442695, %v279_v33  ;;  %v334_v25 = vld [vmem:[#allocation2] sm:$0x30] }
 0x22e   :  { %1149 = vpow2.f32 %v1098_v26 }
 0x234   :  { %v1150_v27 = vpop.eup %1149 }
 0x235   :  { %v287_v28 = vadd.f32 1.0, %v1150_v27  ;;  %v341_v27 = vrot.slane %v334_v25, 4 }
 0x237   :  { %1151 = vrcp.f32 %v287_v28  ;;  %v300_v36 = vand.u32 2147483648, %v287_v28  ;;  %v298_v38 = vand.u32 2147483647, %v287_v28  ;;  %vm294_vm13 = vweird.f32 %v287_v28 }
 0x238   :  { %1153 = vtanh.f32 %v279_v33 }
 0x239   :  { %v301_v40 = vor.u32 1.1754944e-38, %v300_v36  ;;  %vm299_vm15 = vcmp.eq.f32.partialorder %v298_v38, 8.507059e+37  ;;  %1155 = vpow2.f32 %v1099_v45 }
 0x23d   :  { %v1152_v32 = vpop.eup %1151 }
 0x23e   :  { %v290_v34 = vmul.f32 %v1152_v32, %v287_v28  ;;  %vm295_vm12 = vweird.f32 %v1152_v32  ;;  %v1154_v42 = vpop.eup %1153 }
 0x23f   :  { %vm296_vm14 = vmor %vm294_vm13, %vm295_vm12  ;;  %v1156_v46 = vpop.eup %1155 }
 0x240   :  { %v291_v35 = vsub.f32 1.0, %v290_v34  ;;  %v288_v47 = vadd.f32 1.0, %v1156_v46 }
 0x242   :  { %v292_v37 = vmul.f32 %v1152_v32, %v291_v35  ;;  %1157 = vrcp.f32 %v288_v47  ;;  %v315_v57 = vand.u32 2147483648, %v288_v47  ;;  %vm309_vm1 = vweird.f32 %v288_v47 }
 0x243   :  { %v313_v58 = vand.u32 2147483647, %v288_v47 }
 0x244   :  { %v293_v39 = vadd.f32 %v1152_v32, %v292_v37  ;;  %v316_v60 = vor.u32 1.1754944e-38, %v315_v57 }
 0x245   :  { %vm314_vm3 = vcmp.eq.f32.partialorder %v313_v58, 8.507059e+37 }
 0x246   :  { %v297_v41 = vsel %vm296_vm14, %v1152_v32, %v293_v39 }
 0x247   :  { %v302_v43 = vsel %vm299_vm15, %v301_v40, %v297_v41 }
 0x248   :  { %v325_v44 = vmul.f32 %v1154_v42, %v302_v43  ;;  %v1158_v48 = vpop.eup %1157  ;;  %v324_v53 = vmul.f32 %v322_v51, %v302_v43 }
 0x249   :  { %v305_v49 = vmul.f32 %v1158_v48, %v288_v47  ;;  %vm310_vm0 = vweird.f32 %v1158_v48 }
 0x24a   :  { %327 = vrot.lane.b32.xlu2 %v325_v44, %s1301_s1  ;;  %vm311_vm2 = vmor %vm309_vm1, %vm310_vm0 }
 0x24b   :  { %v306_v50 = vsub.f32 1.0, %v305_v49 }
 0x24d   :  { %v307_v52 = vmul.f32 %v1158_v48, %v306_v50 }
 0x24f   :  { %v308_v56 = vadd.f32 %v1158_v48, %v307_v52 }
 0x251   :  { %v312_v59 = vsel %vm311_vm2, %v1158_v48, %v308_v56 }
 0x252   :  { %v317_v62 = vsel %vm314_vm3, %v316_v60, %v312_v59  ;;  %v434_v60 = vld [vmem:[#allocation2 + $0x10] sm:$0xc0] }
 0x2a4   :  { %v328_v54 = vpop.permute.xlu2 %327 }
 0x2a5   :  { %v1493_v55 = vadd.f32 %v328_v54, %v324_v53 }
 0x2a7   :  { %1159 = vtanh.f32 %v1493_v55 }
 0x2ad   :  { %v1160_v61 = vpop.eup %1159 }
 0x2ae   :  { %v332_v5 = vmul.f32 %v1160_v61, %v317_v62  ;;  %v441_v61 = vrot.slane %v434_v60, 6 }
 0x2b0   :  { %336 = vrot.lane.b32.xlu2 %v332_v5, %s1301_s1 }
 0x30a   :  { %v337_v7 = vpop.permute.xlu2 %336 }
 0x30b   :  { %1100 = vmatmul.msk.f32.vlgmr.msrb.gmra.mxu2 %vm123_vm11, %v337_v7  ;;  %1101 = vmatmul.msk.f32.vlgmr.msrb.gmra.mxu3 %vm123_vm11, %v337_v7 }
 0x30c   :  { %752 = vmatpush.msrb.mxu2 %v1337_v0  ;;  %772 = vmatpush.msrb.mxu3 %v1342_v2 }
 0x30e   :  { %753 = vmatpush.msrb.mxu2 %v1339_v1  ;;  %773 = vmatpush.msrb.mxu3 %v1347_v4 }
 0x310   :  { %754 = vmatpush.msrb.mxu2 %v1344_v3  ;;  %774 = vmatpush.msrb.mxu3 %v1354_v6 }
 0x312   :  { %755 = vmatpush.msrb.mxu2 %v1359_v8  ;;  %775 = vmatpush.msrb.mxu3 %v1364_v9 }
 0x314   :  { %756 = vmatpush.msrb.mxu2 %v1370_v11  ;;  %776 = vmatpush.msrb.mxu3 %v1375_v12 }
 0x316   :  { %757 = vmatpush.msrb.mxu2 %v1378_v13  ;;  %777 = vmatpush.msrb.mxu3 %v1383_v14 }
 0x318   :  { %758 = vmatpush.msrb.mxu2 %v1386_v15  ;;  %778 = vmatpush.msrb.mxu3 %v1391_v16 }
 0x31a   :  { %759 = vmatpush.msrb.mxu2 %v1394_v17  ;;  %779 = vmatpush.msrb.mxu3 %v1399_v18 }
 0x38e   :  { %v363_v20 = vpop.f32.mrf.mxu2  ;;  %v383_v26 = vpop.f32.mrf.mxu3 }
 0x38f   :  { %v364_v21 = vadd.f32 %v363_v20, %v340_v19  ;;  %v384_v29 = vadd.f32 %v383_v26, %v341_v27  ;;  %v435_v20 = vld [vmem:[#allocation2] sm:$0xc0] }
 0x391   :  { %v1102_v22 = vmul.f32 -1.442695, %v364_v21  ;;  %v1103_v41 = vmul.f32 -1.442695, %v384_v29 }
 0x393   :  { %1161 = vpow2.f32 %v1102_v22  ;;  %v442_v22 = vrot.slane %v435_v20, 6 }
 0x399   :  { %v1162_v23 = vpop.eup %1161 }
 0x39a   :  { %v392_v24 = vadd.f32 1.0, %v1162_v23 }
 0x39c   :  { %1163 = vrcp.f32 %v392_v24  ;;  %v405_v32 = vand.u32 2147483648, %v392_v24  ;;  %v403_v34 = vand.u32 2147483647, %v392_v24  ;;  %vm399_vm5 = vweird.f32 %v392_v24 }
 0x39d   :  { %1165 = vtanh.f32 %v384_v29 }
 0x39e   :  { %v406_v36 = vor.u32 1.1754944e-38, %v405_v32  ;;  %vm404_vm7 = vcmp.eq.f32.partialorder %v403_v34, 8.507059e+37  ;;  %1167 = vpow2.f32 %v1103_v41 }
 0x3a2   :  { %v1164_v28 = vpop.eup %1163 }
 0x3a3   :  { %v395_v30 = vmul.f32 %v1164_v28, %v392_v24  ;;  %vm400_vm4 = vweird.f32 %v1164_v28  ;;  %v1166_v38 = vpop.eup %1165 }
 0x3a4   :  { %vm401_vm6 = vmor %vm399_vm5, %vm400_vm4  ;;  %v1168_v42 = vpop.eup %1167 }
 0x3a5   :  { %v396_v31 = vsub.f32 1.0, %v395_v30  ;;  %v393_v43 = vadd.f32 1.0, %v1168_v42 }
 0x3a7   :  { %v397_v33 = vmul.f32 %v1164_v28, %v396_v31  ;;  %1169 = vrcp.f32 %v393_v43  ;;  %v420_v52 = vand.u32 2147483648, %v393_v43  ;;  %vm414_vm9 = vweird.f32 %v393_v43 }
 0x3a8   :  { %v418_v53 = vand.u32 2147483647, %v393_v43 }
 0x3a9   :  { %v398_v35 = vadd.f32 %v1164_v28, %v397_v33  ;;  %v421_v56 = vor.u32 1.1754944e-38, %v420_v52 }
 0x3aa   :  { %vm419_vm12 = vcmp.eq.f32.partialorder %v418_v53, 8.507059e+37 }
 0x3ab   :  { %v402_v37 = vsel %vm401_vm6, %v1164_v28, %v398_v35 }
 0x3ac   :  { %v407_v39 = vsel %vm404_vm7, %v406_v36, %v402_v37 }
 0x3ad   :  { %v426_v40 = vmul.f32 %v1166_v38, %v407_v39  ;;  %v1170_v44 = vpop.eup %1169  ;;  %v425_v48 = vmul.f32 %v407_v39, %v1493_v55 }
 0x3ae   :  { %v410_v45 = vmul.f32 %v1170_v44, %v393_v43  ;;  %vm415_vm8 = vweird.f32 %v1170_v44 }
 0x3af   :  { %428 = vrot.lane.b32.xlu0 %v426_v40, %s1301_s1  ;;  %vm416_vm10 = vmor %vm414_vm9, %vm415_vm8 }
 0x3b0   :  { %v411_v46 = vsub.f32 1.0, %v410_v45 }
 0x3b2   :  { %v412_v47 = vmul.f32 %v1170_v44, %v411_v46 }
 0x3b4   :  { %v413_v51 = vadd.f32 %v1170_v44, %v412_v47 }
 0x3b6   :  { %v417_v54 = vsel %vm416_vm10, %v1170_v44, %v413_v51 }
 0x3b7   :  { %v422_v58 = vsel %vm419_vm12, %v421_v56, %v417_v54 }
 0x421   :  { %v429_v49 = vpop.permute.xlu0 %428 }
 0x422   :  { %v1517_v50 = vadd.f32 %v429_v49, %v425_v48 }
 0x424   :  { %1171 = vtanh.f32 %v1517_v50 }
 0x42a   :  { %v1172_v57 = vpop.eup %1171 }
 0x42b   :  { %v433_v59 = vmul.f32 %v1172_v57, %v422_v58 }
 0x42d   :  { %437 = vrot.lane.b32.xlu1 %v433_v59, %s1301_s1 }
 0x49f   :  { %v438_v55 = vpop.permute.xlu1 %437 }
 0x4a0   :  { %1104 = vmatmul.msk.f32.vlgmr.msra.gmra.mxu0 %vm123_vm11, %v438_v55  ;;  %1105 = vmatmul.msk.f32.vlgmr.msra.gmra.mxu1 %vm123_vm11, %v438_v55 }
 0x4a1   :  { %853 = vmatpush.msra.mxu0 %v1337_v0  ;;  %873 = vmatpush.msra.mxu1 %v1342_v2 }
 0x4a3   :  { %854 = vmatpush.msra.mxu0 %v1339_v1  ;;  %874 = vmatpush.msra.mxu1 %v1347_v4 }
 0x4a5   :  { %855 = vmatpush.msra.mxu0 %v1344_v3  ;;  %875 = vmatpush.msra.mxu1 %v1354_v6 }
 0x4a7   :  { %856 = vmatpush.msra.mxu0 %v1359_v8  ;;  %876 = vmatpush.msra.mxu1 %v1364_v9 }
 0x4a9   :  { %857 = vmatpush.msra.mxu0 %v1370_v11  ;;  %877 = vmatpush.msra.mxu1 %v1375_v12 }
 0x4ab   :  { %858 = vmatpush.msra.mxu0 %v1378_v13  ;;  %878 = vmatpush.msra.mxu1 %v1383_v14 }
 0x4ad   :  { %859 = vmatpush.msra.mxu0 %v1386_v15  ;;  %879 = vmatpush.msra.mxu1 %v1391_v16 }
 0x4af   :  { %860 = vmatpush.msra.mxu0 %v1394_v17  ;;  %880 = vmatpush.msra.mxu1 %v1399_v18 }
 0x51d   :  { %v464_v62 = vpop.f32.mrf.mxu0  ;;  %v484_v21 = vpop.f32.mrf.mxu1 }
 0x51e   :  { %v465_v5 = vadd.f32 %v464_v62, %v441_v61  ;;  %v485_v24 = vadd.f32 %v484_v21, %v442_v22 }
 0x520   :  { %v1106_v7 = vmul.f32 -1.442695, %v465_v5  ;;  %v1107_v36 = vmul.f32 -1.442695, %v485_v24 }
 0x522   :  { %1173 = vpow2.f32 %v1106_v7 }
 0x528   :  { %v1174_v10 = vpop.eup %1173 }
 0x529   :  { %v493_v19 = vadd.f32 1.0, %v1174_v10 }
 0x52b   :  { %1175 = vrcp.f32 %v493_v19  ;;  %v506_v27 = vand.u32 2147483648, %v493_v19  ;;  %v504_v29 = vand.u32 2147483647, %v493_v19  ;;  %vm500_vm14 = vweird.f32 %v493_v19 }
 0x52c   :  { %1177 = vtanh.f32 %v485_v24 }
 0x52d   :  { %v507_v31 = vor.u32 1.1754944e-38, %v506_v27  ;;  %vm505_vm0 = vcmp.eq.f32.partialorder %v504_v29, 8.507059e+37  ;;  %1179 = vpow2.f32 %v1107_v36 }
 0x531   :  { %v1176_v23 = vpop.eup %1175 }
 0x532   :  { %v496_v25 = vmul.f32 %v1176_v23, %v493_v19  ;;  %vm501_vm13 = vweird.f32 %v1176_v23  ;;  %v1178_v33 = vpop.eup %1177 }
 0x533   :  { %vm502_vm15 = vmor %vm500_vm14, %vm501_vm13  ;;  %v1180_v37 = vpop.eup %1179 }
 0x534   :  { %v497_v26 = vsub.f32 1.0, %v496_v25  ;;  %v494_v38 = vadd.f32 1.0, %v1180_v37 }
 0x536   :  { %v498_v28 = vmul.f32 %v1176_v23, %v497_v26  ;;  %1181 = vrcp.f32 %v494_v38  ;;  %v521_v47 = vand.u32 2147483648, %v494_v38  ;;  %vm515_vm2 = vweird.f32 %v494_v38 }
 0x537   :  { %v519_v48 = vand.u32 2147483647, %v494_v38 }
 0x538   :  { %v499_v30 = vadd.f32 %v1176_v23, %v498_v28  ;;  %v522_v51 = vor.u32 1.1754944e-38, %v521_v47 }
 0x539   :  { %vm520_vm4 = vcmp.eq.f32.partialorder %v519_v48, 8.507059e+37 }
 0x53a   :  { %v503_v32 = vsel %vm502_vm15, %v1176_v23, %v499_v30 }
 0x53b   :  { %v508_v34 = vsel %vm505_vm0, %v507_v31, %v503_v32  ;;  %v630_v32 = vld [vmem:[#allocation2 + $0x18] sm:$0xc] }
 0x53c   :  { %v527_v35 = vmul.f32 %v1178_v33, %v508_v34  ;;  %v1182_v39 = vpop.eup %1181  ;;  %v526_v43 = vmul.f32 %v508_v34, %v1517_v50  ;;  %v637_v33 = vrot.slane %v630_v32, 2 }
 0x53d   :  { %v511_v40 = vmul.f32 %v1182_v39, %v494_v38  ;;  %vm516_vm1 = vweird.f32 %v1182_v39 }
 0x53e   :  { %529 = vrot.lane.b32.xlu2 %v527_v35, %s1301_s1  ;;  %vm517_vm3 = vmor %vm515_vm2, %vm516_vm1 }
 0x53f   :  { %v512_v41 = vsub.f32 1.0, %v511_v40 }
 0x541   :  { %v513_v42 = vmul.f32 %v1182_v39, %v512_v41 }
 0x543   :  { %v514_v46 = vadd.f32 %v1182_v39, %v513_v42 }
 0x545   :  { %v518_v49 = vsel %vm517_vm3, %v1182_v39, %v514_v46  ;;  %v631_v39 = vld [vmem:[#allocation2 + $0x8] sm:$0xc] }
 0x546   :  { %v523_v53 = vsel %vm520_vm4, %v522_v51, %v518_v49  ;;  %v638_v41 = vrot.slane %v631_v39, 2 }
 0x598   :  { %v530_v44 = vpop.permute.xlu2 %529 }
 0x599   :  { %v1541_v45 = vadd.f32 %v530_v44, %v526_v43 }
 0x59b   :  { %1183 = vtanh.f32 %v1541_v45 }
 0x5a1   :  { %v1184_v52 = vpop.eup %1183 }
 0x5a2   :  { %v534_v54 = vmul.f32 %v1184_v52, %v523_v53 }
 0x5a4   :  { %538 = vrot.lane.b32.xlu0 %v534_v54, %s1301_s1 }
 0x616   :  { %v539_v50 = vpop.permute.xlu0 %538 }
 0x617   :  { %1108 = vmatmul.msk.f32.vlgmr.msra.gmra.mxu2 %vm123_vm11, %v539_v50  ;;  %1109 = vmatmul.msk.f32.vlgmr.msra.gmra.mxu3 %vm123_vm11, %v539_v50 }
 0x618   :  { %946 = vmatpush.msra.mxu2 %v1337_v0  ;;  %966 = vmatpush.msra.mxu3 %v1342_v2  ;;  %v535_v0 = vld [vmem:[#allocation2 + $0x18] sm:$0x3] }
 0x61a   :  { %947 = vmatpush.msra.mxu2 %v1339_v1  ;;  %967 = vmatpush.msra.mxu3 %v1347_v4 }
 0x61c   :  { %948 = vmatpush.msra.mxu2 %v1344_v3  ;;  %968 = vmatpush.msra.mxu3 %v1354_v6 }
 0x61e   :  { %949 = vmatpush.msra.mxu2 %v1359_v8  ;;  %969 = vmatpush.msra.mxu3 %v1364_v9  ;;  %v536_v9 = vld [vmem:[#allocation2 + $0x8] sm:$0x3] }
 0x620   :  { %950 = vmatpush.msra.mxu2 %v1370_v11  ;;  %970 = vmatpush.msra.mxu3 %v1375_v12 }
 0x622   :  { %951 = vmatpush.msra.mxu2 %v1378_v13  ;;  %971 = vmatpush.msra.mxu3 %v1383_v14 }
 0x624   :  { %952 = vmatpush.msra.mxu2 %v1386_v15  ;;  %972 = vmatpush.msra.mxu3 %v1391_v16 }
 0x626   :  { %953 = vmatpush.msra.mxu2 %v1394_v17  ;;  %973 = vmatpush.msra.mxu3 %v1399_v18 }
 0x69a   :  { %v559_v1 = vpop.f32.mrf.mxu2  ;;  %v579_v8 = vpop.f32.mrf.mxu3 }
 0x69b   :  { %v560_v2 = vadd.f32 %v559_v1, %v535_v0  ;;  %v580_v12 = vadd.f32 %v579_v8, %v536_v9 }
 0x69d   :  { %v1110_v3 = vmul.f32 -1.442695, %v560_v2  ;;  %v1111_v60 = vmul.f32 -1.442695, %v580_v12 }
 0x69f   :  { %1185 = vpow2.f32 %v1110_v3 }
 0x6a5   :  { %v1186_v4 = vpop.eup %1185 }
 0x6a6   :  { %v588_v6 = vadd.f32 1.0, %v1186_v4 }
 0x6a8   :  { %1187 = vrcp.f32 %v588_v6  ;;  %v601_v15 = vand.u32 2147483648, %v588_v6  ;;  %v599_v17 = vand.u32 2147483647, %v588_v6  ;;  %vm595_vm6 = vweird.f32 %v588_v6 }
 0x6a9   :  { %1189 = vtanh.f32 %v580_v12 }
 0x6aa   :  { %v602_v56 = vor.u32 1.1754944e-38, %v601_v15  ;;  %vm600_vm8 = vcmp.eq.f32.partialorder %v599_v17, 8.507059e+37  ;;  %1191 = vpow2.f32 %v1111_v60 }
 0x6ae   :  { %v1188_v11 = vpop.eup %1187 }
 0x6af   :  { %v591_v13 = vmul.f32 %v1188_v11, %v588_v6  ;;  %vm596_vm5 = vweird.f32 %v1188_v11  ;;  %v1190_v58 = vpop.eup %1189 }
 0x6b0   :  { %vm597_vm7 = vmor %vm595_vm6, %vm596_vm5  ;;  %v1192_v61 = vpop.eup %1191 }
 0x6b1   :  { %v592_v14 = vsub.f32 1.0, %v591_v13  ;;  %v589_v62 = vadd.f32 1.0, %v1192_v61 }
 0x6b3   :  { %v593_v16 = vmul.f32 %v1188_v11, %v592_v14  ;;  %1193 = vrcp.f32 %v589_v62  ;;  %v616_v24 = vand.u32 2147483648, %v589_v62  ;;  %vm610_vm10 = vweird.f32 %v589_v62 }
 0x6b4   :  { %v614_v25 = vand.u32 2147483647, %v589_v62 }
 0x6b5   :  { %v594_v18 = vadd.f32 %v1188_v11, %v593_v16  ;;  %v617_v27 = vor.u32 1.1754944e-38, %v616_v24 }
 0x6b6   :  { %vm615_vm13 = vcmp.eq.f32.partialorder %v614_v25, 8.507059e+37 }
 0x6b7   :  { %v598_v57 = vsel %vm597_vm7, %v1188_v11, %v594_v18 }
 0x6b8   :  { %v603_v59 = vsel %vm600_vm8, %v602_v56, %v598_v57 }
 0x6b9   :  { %v622_v55 = vmul.f32 %v1190_v58, %v603_v59  ;;  %v1194_v5 = vpop.eup %1193  ;;  %v621_v20 = vmul.f32 %v603_v59, %v1541_v45  ;;  %v731_v59 = vld [vmem:[#allocation2 + $0x18] sm:$0x30] }
 0x6ba   :  { %v606_v7 = vmul.f32 %v1194_v5, %v589_v62  ;;  %vm611_vm9 = vweird.f32 %v1194_v5 }
 0x6bb   :  { %624 = vrot.lane.b32.xlu1 %v622_v55, %s1301_s1  ;;  %vm612_vm12 = vmor %vm610_vm10, %vm611_vm9  ;;  %v738_v55 = vrot.slane %v731_v59, 4 }
 0x6bc   :  { %v607_v10 = vsub.f32 1.0, %v606_v7 }
 0x6be   :  { %v608_v19 = vmul.f32 %v1194_v5, %v607_v10  ;;  %v732_v10 = vld [vmem:[#allocation2 + $0x8] sm:$0x30] }
 0x6c0   :  { %v609_v23 = vadd.f32 %v1194_v5, %v608_v19 }
 0x6c2   :  { %v613_v26 = vsel %vm612_vm12, %v1194_v5, %v609_v23 }
 0x6c3   :  { %v618_v29 = vsel %vm615_vm13, %v617_v27, %v613_v26 }
 0x72d   :  { %v625_v21 = vpop.permute.xlu1 %624 }
 0x72e   :  { %v627_v22 = vadd.f32 %v625_v21, %v621_v20  ;;  %v739_v20 = vrot.slane %v732_v10, 4 }
 0x730   :  { %1195 = vtanh.f32 %v627_v22 }
 0x736   :  { %v1196_v28 = vpop.eup %1195 }
 0x737   :  { %v629_v30 = vmul.f32 %v1196_v28, %v618_v29 }
 0x739   :  { %633 = vrot.lane.b32.xlu2 %v629_v30, %s1301_s1 }
 0x793   :  { %v634_v31 = vpop.permute.xlu2 %633 }
 0x794   :  { %1112 = vmatmul.msk.f32.vlgmr.msrb.gmra.mxu0 %vm123_vm11, %v634_v31  ;;  %1113 = vmatmul.msk.f32.vlgmr.msrb.gmra.mxu1 %vm123_vm11, %v634_v31 }
 0x811   :  { %v660_v34 = vpop.f32.mrf.mxu0  ;;  %v680_v40 = vpop.f32.mrf.mxu1 }
 0x812   :  { %v661_v35 = vadd.f32 %v660_v34, %v637_v33  ;;  %v681_v43 = vadd.f32 %v680_v40, %v638_v41 }
 0x814   :  { %v1114_v36 = vmul.f32 -1.442695, %v661_v35  ;;  %v1115_v0 = vmul.f32 -1.442695, %v681_v43 }
 0x816   :  { %1197 = vpow2.f32 %v1114_v36 }
 0x81c   :  { %v1198_v37 = vpop.eup %1197 }
 0x81d   :  { %v689_v38 = vadd.f32 1.0, %v1198_v37 }
 0x81f   :  { %1199 = vrcp.f32 %v689_v38  ;;  %v702_v46 = vand.u32 2147483648, %v689_v38  ;;  %v700_v48 = vand.u32 2147483647, %v689_v38  ;;  %vm696_vm15 = vweird.f32 %v689_v38 }
 0x820   :  { %1201 = vtanh.f32 %v681_v43 }
 0x821   :  { %v703_v51 = vor.u32 1.1754944e-38, %v702_v46  ;;  %vm701_vm1 = vcmp.eq.f32.partialorder %v700_v48, 8.507059e+37  ;;  %1203 = vpow2.f32 %v1115_v0 }
 0x825   :  { %v1200_v42 = vpop.eup %1199 }
 0x826   :  { %v692_v44 = vmul.f32 %v1200_v42, %v689_v38  ;;  %vm697_vm14 = vweird.f32 %v1200_v42  ;;  %v1202_v53 = vpop.eup %1201 }
 0x827   :  { %vm698_vm0 = vmor %vm696_vm15, %vm697_vm14  ;;  %v1204_v1 = vpop.eup %1203 }
 0x828   :  { %v693_v45 = vsub.f32 1.0, %v692_v44  ;;  %v690_v2 = vadd.f32 1.0, %v1204_v1 }
 0x82a   :  { %v694_v47 = vmul.f32 %v1200_v42, %v693_v45  ;;  %1205 = vrcp.f32 %v690_v2  ;;  %v717_v14 = vand.u32 2147483648, %v690_v2  ;;  %vm711_vm3 = vweird.f32 %v690_v2 }
 0x82b   :  { %v715_v15 = vand.u32 2147483647, %v690_v2 }
 0x82c   :  { %v695_v49 = vadd.f32 %v1200_v42, %v694_v47  ;;  %v718_v17 = vor.u32 1.1754944e-38, %v717_v14 }
 0x82d   :  { %vm716_vm5 = vcmp.eq.f32.partialorder %v715_v15, 8.507059e+37 }
 0x82e   :  { %v699_v52 = vsel %vm698_vm0, %v1200_v42, %v695_v49 }
 0x82f   :  { %v704_v54 = vsel %vm701_vm1, %v703_v51, %v699_v52 }
 0x830   :  { %v723_v50 = vmul.f32 %v1202_v53, %v704_v54  ;;  %v1206_v3 = vpop.eup %1205  ;;  %v722_v9 = vmul.f32 %v704_v54, %v627_v22  ;;  %v832_v54 = vld [vmem:[#allocation2 + $0x18] sm:$0xc0] }
 0x831   :  { %v707_v4 = vmul.f32 %v1206_v3, %v690_v2  ;;  %vm712_vm2 = vweird.f32 %v1206_v3 }
 0x832   :  { %725 = vrot.lane.b32.xlu0 %v723_v50, %s1301_s1  ;;  %vm713_vm4 = vmor %vm711_vm3, %vm712_vm2  ;;  %v839_v50 = vrot.slane %v832_v54, 6 }
 0x833   :  { %v708_v6 = vsub.f32 1.0, %v707_v4 }
 0x835   :  { %v709_v8 = vmul.f32 %v1206_v3, %v708_v6  ;;  %v833_v6 = vld [vmem:[#allocation2 + $0x8] sm:$0xc0] }
 0x837   :  { %v710_v13 = vadd.f32 %v1206_v3, %v709_v8 }
 0x839   :  { %v714_v16 = vsel %vm713_vm4, %v1206_v3, %v710_v13 }
 0x83a   :  { %v719_v56 = vsel %vm716_vm5, %v718_v17, %v714_v16 }
 0x8a4   :  { %v726_v11 = vpop.permute.xlu0 %725 }
 0x8a5   :  { %v728_v12 = vadd.f32 %v726_v11, %v722_v9  ;;  %v840_v9 = vrot.slane %v833_v6, 6 }
 0x8a7   :  { %1207 = vtanh.f32 %v728_v12 }
 0x8ad   :  { %v1208_v18 = vpop.eup %1207 }
 0x8ae   :  { %v730_v57 = vmul.f32 %v1208_v18, %v719_v56 }
 0x8b0   :  { %734 = vrot.lane.b32.xlu1 %v730_v57, %s1301_s1 }
 0x922   :  { %v735_v58 = vpop.permute.xlu1 %734 }
 0x923   :  { %1116 = vmatmul.msk.f32.vlgmr.msrb.gmra.mxu2 %vm123_vm11, %v735_v58  ;;  %1117 = vmatmul.msk.f32.vlgmr.msrb.gmra.mxu3 %vm123_vm11, %v735_v58 }
 0x9a6   :  { %v761_v60 = vpop.f32.mrf.mxu2  ;;  %v781_v19 = vpop.f32.mrf.mxu3 }
 0x9a7   :  { %v762_v61 = vadd.f32 %v761_v60, %v738_v55  ;;  %v782_v22 = vadd.f32 %v781_v19, %v739_v20 }
 0x9a9   :  { %v1118_v62 = vmul.f32 -1.442695, %v762_v61  ;;  %v1119_v34 = vmul.f32 -1.442695, %v782_v22 }
 0x9ab   :  { %1209 = vpow2.f32 %v1118_v62 }
 0x9b1   :  { %v1210_v5 = vpop.eup %1209 }
 0x9b2   :  { %v790_v7 = vadd.f32 1.0, %v1210_v5 }
 0x9b4   :  { %1211 = vrcp.f32 %v790_v7  ;;  %v803_v25 = vand.u32 2147483648, %v790_v7  ;;  %v801_v27 = vand.u32 2147483647, %v790_v7  ;;  %vm797_vm7 = vweird.f32 %v790_v7 }
 0x9b5   :  { %1213 = vtanh.f32 %v782_v22 }
 0x9b6   :  { %v804_v29 = vor.u32 1.1754944e-38, %v803_v25  ;;  %vm802_vm9 = vcmp.eq.f32.partialorder %v801_v27, 8.507059e+37  ;;  %1215 = vpow2.f32 %v1119_v34 }
 0x9ba   :  { %v1212_v21 = vpop.eup %1211 }
 0x9bb   :  { %v793_v23 = vmul.f32 %v1212_v21, %v790_v7  ;;  %vm798_vm6 = vweird.f32 %v1212_v21  ;;  %v1214_v31 = vpop.eup %1213 }
 0x9bc   :  { %vm799_vm8 = vmor %vm797_vm7, %vm798_vm6  ;;  %v1216_v35 = vpop.eup %1215 }
 0x9bd   :  { %v794_v24 = vsub.f32 1.0, %v793_v23  ;;  %v791_v36 = vadd.f32 1.0, %v1216_v35 }
 0x9bf   :  { %v795_v26 = vmul.f32 %v1212_v21, %v794_v24  ;;  %1217 = vrcp.f32 %v791_v36  ;;  %v818_v45 = vand.u32 2147483648, %v791_v36  ;;  %vm812_vm12 = vweird.f32 %v791_v36 }
 0x9c0   :  { %v816_v46 = vand.u32 2147483647, %v791_v36 }
 0x9c1   :  { %v796_v28 = vadd.f32 %v1212_v21, %v795_v26  ;;  %v819_v48 = vor.u32 1.1754944e-38, %v818_v45 }
 0x9c2   :  { %vm817_vm14 = vcmp.eq.f32.partialorder %v816_v46, 8.507059e+37 }
 0x9c3   :  { %v800_v30 = vsel %vm799_vm8, %v1212_v21, %v796_v28 }
 0x9c4   :  { %v805_v32 = vsel %vm802_vm9, %v804_v29, %v800_v30 }
 0x9c5   :  { %v824_v33 = vmul.f32 %v1214_v31, %v805_v32  ;;  %v1218_v37 = vpop.eup %1217  ;;  %v823_v41 = vmul.f32 %v805_v32, %v728_v12 }
 0x9c6   :  { %v808_v38 = vmul.f32 %v1218_v37, %v791_v36  ;;  %vm813_vm10 = vweird.f32 %v1218_v37 }
 0x9c7   :  { %826 = vrot.lane.b32.xlu2 %v824_v33, %s1301_s1  ;;  %vm814_vm13 = vmor %vm812_vm12, %vm813_vm10 }
 0x9c8   :  { %v809_v39 = vsub.f32 1.0, %v808_v38 }
 0x9ca   :  { %v810_v40 = vmul.f32 %v1218_v37, %v809_v39 }
 0x9cc   :  { %v811_v44 = vadd.f32 %v1218_v37, %v810_v40 }
 0x9ce   :  { %v815_v47 = vsel %vm814_vm13, %v1218_v37, %v811_v44 }
 0x9cf   :  { %v820_v51 = vsel %vm817_vm14, %v819_v48, %v815_v47 }
 0xa21   :  { %v827_v42 = vpop.permute.xlu2 %826 }
 0xa22   :  { %v829_v43 = vadd.f32 %v827_v42, %v823_v41 }
 0xa24   :  { %1219 = vtanh.f32 %v829_v43 }
 0xa2a   :  { %v1220_v49 = vpop.eup %1219 }
 0xa2b   :  { %v831_v52 = vmul.f32 %v1220_v49, %v820_v51 }
 0xa2d   :  { %835 = vrot.lane.b32.xlu0 %v831_v52, %s1301_s1 }
 0xa9f   :  { %v836_v53 = vpop.permute.xlu0 %835 }
 0xaa0   :  { %1120 = vmatmul.msk.f32.vlgmr.msra.gmra.mxu0 %vm123_vm11, %v836_v53  ;;  %1121 = vmatmul.msk.f32.vlgmr.msra.gmra.mxu1 %vm123_vm11, %v836_v53 }
 0xb1d   :  { %v862_v0 = vpop.f32.mrf.mxu0  ;;  %v882_v8 = vpop.f32.mrf.mxu1 }
 0xb1e   :  { %v863_v1 = vadd.f32 %v862_v0, %v839_v50  ;;  %v883_v12 = vadd.f32 %v882_v8, %v840_v9 }
 0xb20   :  { %v1122_v2 = vmul.f32 -1.442695, %v863_v1  ;;  %v1123_v60 = vmul.f32 -1.442695, %v883_v12 }
 0xb22   :  { %1221 = vpow2.f32 %v1122_v2 }
 0xb28   :  { %v1222_v3 = vpop.eup %1221 }
 0xb29   :  { %v891_v4 = vadd.f32 1.0, %v1222_v3 }
 0xb2b   :  { %1223 = vrcp.f32 %v891_v4  ;;  %v904_v15 = vand.u32 2147483648, %v891_v4  ;;  %v902_v17 = vand.u32 2147483647, %v891_v4  ;;  %vm898_vm0 = vweird.f32 %v891_v4 }
 0xb2c   :  { %1225 = vtanh.f32 %v883_v12 }
 0xb2d   :  { %v905_v56 = vor.u32 1.1754944e-38, %v904_v15  ;;  %vm903_vm2 = vcmp.eq.f32.partialorder %v902_v17, 8.507059e+37  ;;  %1227 = vpow2.f32 %v1123_v60  ;;  %v1038_v17 = vld [vmem:[%s1610_s3 + $0x18] sm:$0xff]  ;;  %v1136_v60 = vld [vmem:[%s1611_s4] ss:$0 sm:$0xff] }
 0xb2e   :  { %1061 = vmatpush.msrb.mxu0 %v1038_v17 }
 0xb31   :  { %v1224_v11 = vpop.eup %1223 }
 0xb32   :  { %v894_v13 = vmul.f32 %v1224_v11, %v891_v4  ;;  %vm899_vm15 = vweird.f32 %v1224_v11  ;;  %v1226_v58 = vpop.eup %1225 }
 0xb33   :  { %vm900_vm1 = vmor %vm898_vm0, %vm899_vm15  ;;  %v1228_v61 = vpop.eup %1227  ;;  %vm1026_vm15 = vcmp.ge.s32.totalorder %v1470_v63, 32  ;;  %vm1027_vm0 = vcmp.lt.s32.totalorder %v1470_v63, 64 }
 0xb34   :  { %v895_v14 = vsub.f32 1.0, %v894_v13  ;;  %v892_v62 = vadd.f32 1.0, %v1228_v61 }
 0xb36   :  { %v896_v16 = vmul.f32 %v1224_v11, %v895_v14  ;;  %1229 = vrcp.f32 %v892_v62  ;;  %v919_v24 = vand.u32 2147483648, %v892_v62  ;;  %vm913_vm4 = vweird.f32 %v892_v62 }
 0xb37   :  { %v917_v25 = vand.u32 2147483647, %v892_v62 }
 0xb38   :  { %v897_v18 = vadd.f32 %v1224_v11, %v896_v16  ;;  %v920_v27 = vor.u32 1.1754944e-38, %v919_v24 }
 0xb39   :  { %vm918_vm6 = vcmp.eq.f32.partialorder %v917_v25, 8.507059e+37 }
 0xb3a   :  { %v901_v57 = vsel %vm900_vm1, %v1224_v11, %v897_v18  ;;  %v1037_v18 = vld [vmem:[%s1610_s3 + $0x10] sm:$0xff]  ;;  %vm1028_vm1 = vmand %vm1026_vm15, %vm1027_vm0 }
 0xb3b   :  { %v906_v59 = vsel %vm903_vm2, %v905_v56, %v901_v57  ;;  %v1036_v56 = vld [vmem:[%s1610_s3 + $0x8] sm:$0xff]  ;;  %1062 = vmatpush.msrb.mxu0 %v1037_v18  ;;  %v1035_v57 = vld [vmem:[%s1610_s3] sm:$0xff]  ;;  %vm1046_vm2 = vcmask 261120   ;;  %s1303_s3 = smov [#allocation6]  }
 0xb3c   :  { %v925_v55 = vmul.f32 %v1226_v58, %v906_v59  ;;  %v1230_v5 = vpop.eup %1229  ;;  %v924_v20 = vmul.f32 %v906_v59, %v829_v43  ;;  %s1076_s17 = sshll.u32 %s1303_s3, 4  ;;  %s1077_s17 = int_to_ptr.vmem [resolvable:$true] %s1076_s17 }
 0xb3d   :  { %v909_v7 = vmul.f32 %v1230_v5, %v892_v62  ;;  %vm914_vm3 = vweird.f32 %v1230_v5  ;;  %1063 = vmatpush.msrb.mxu0 %v1036_v56 }
 0xb3e   :  { %927 = vrot.lane.b32.xlu1 %v925_v55, %s1301_s1  ;;  %vm915_vm5 = vmor %vm913_vm4, %vm914_vm3  ;;  %vm1069_vm3 = vcmask 25600  }
 0xb3f   :  { %v910_v10 = vsub.f32 1.0, %v909_v7  ;;  %1064 = vmatpush.msrb.mxu0 %v1035_v57 }
 0xb41   :  { %v911_v19 = vmul.f32 %v1230_v5, %v910_v10 }
 0xb43   :  { %v912_v23 = vadd.f32 %v1230_v5, %v911_v19 }
 0xb45   :  { %v916_v26 = vsel %vm915_vm5, %v1230_v5, %v912_v23 }
 0xb46   :  { %v921_v29 = vsel %vm918_vm6, %v920_v27, %v916_v26 }
 0xbb0   :  { %v928_v21 = vpop.permute.xlu1 %927 }
 0xbb1   :  { %v930_v22 = vadd.f32 %v928_v21, %v924_v20 }
 0xbb3   :  { %1231 = vtanh.f32 %v930_v22 }
 0xbb9   :  { %v1232_v28 = vpop.eup %1231 }
 0xbba   :  { %v932_v30 = vmul.f32 %v1232_v28, %v921_v29 }
 0xbbc   :  { %934 = vrot.lane.b32.xlu2 %v932_v30, %s1301_s1 }
 0xc16   :  { %v1578_v31 = vpop.permute.xlu2 %934 }
 0xc17   :  { %1124 = vmatmul.msk.f32.vlgmr.msra.gmra.mxu2 %vm123_vm11, %v1578_v31  ;;  %1125 = vmatmul.msk.f32.vlgmr.msra.gmra.mxu3 %vm123_vm11, %v1578_v31 }
 0xc9a   :  { %v955_v32 = vpop.f32.mrf.mxu2  ;;  %v975_v37 = vpop.f32.mrf.mxu3 }
 0xc9b   :  { %v956_v33 = vadd.f32 %v955_v32, %v839_v50  ;;  %v976_v39 = vadd.f32 %v975_v37, %v840_v9 }
 0xc9d   :  { %v1126_v34 = vmul.f32 -1.442695, %v956_v33  ;;  %v1127_v52 = vmul.f32 -1.442695, %v976_v39 }
 0xc9f   :  { %1233 = vpow2.f32 %v1126_v34 }
 0xca5   :  { %v1234_v35 = vpop.eup %1233 }
 0xca6   :  { %v984_v36 = vadd.f32 1.0, %v1234_v35 }
 0xca8   :  { %1235 = vrcp.f32 %v984_v36  ;;  %v997_v42 = vand.u32 2147483648, %v984_v36  ;;  %v995_v44 = vand.u32 2147483647, %v984_v36  ;;  %vm991_vm8 = vweird.f32 %v984_v36 }
 0xca9   :  { %1237 = vtanh.f32 %v976_v39 }
 0xcaa   :  { %v998_v46 = vor.u32 1.1754944e-38, %v997_v42  ;;  %vm996_vm9 = vcmp.eq.f32.partialorder %v995_v44, 8.507059e+37  ;;  %1239 = vpow2.f32 %v1127_v52 }
 0xcae   :  { %v1236_v38 = vpop.eup %1235 }
 0xcaf   :  { %v987_v40 = vmul.f32 %v1236_v38, %v984_v36  ;;  %vm992_vm7 = vweird.f32 %v1236_v38  ;;  %v1238_v48 = vpop.eup %1237 }
 0xcb0   :  { %vm993_vm11 = vmor %vm991_vm8, %vm992_vm7  ;;  %v1240_v53 = vpop.eup %1239 }
 0xcb1   :  { %v988_v41 = vsub.f32 1.0, %v987_v40  ;;  %v985_v54 = vadd.f32 1.0, %v1240_v53 }
 0xcb3   :  { %v989_v43 = vmul.f32 %v1236_v38, %v988_v41  ;;  %1241 = vrcp.f32 %v985_v54  ;;  %v1012_v9 = vand.u32 2147483648, %v985_v54  ;;  %vm1006_vm12 = vweird.f32 %v985_v54 }
 0xcb4   :  { %v1010_v11 = vand.u32 2147483647, %v985_v54 }
 0xcb5   :  { %v990_v45 = vadd.f32 %v1236_v38, %v989_v43  ;;  %v1013_v13 = vor.u32 1.1754944e-38, %v1012_v9 }
 0xcb6   :  { %vm1011_vm14 = vcmp.eq.f32.partialorder %v1010_v11, 8.507059e+37 }
 0xcb7   :  { %v994_v47 = vsel %vm993_vm11, %v1236_v38, %v990_v45 }
 0xcb8   :  { %v999_v49 = vsel %vm996_vm9, %v998_v46, %v994_v47 }
 0xcb9   :  { %v1018_v51 = vmul.f32 %v1238_v48, %v999_v49  ;;  %v1242_v50 = vpop.eup %1241  ;;  %v1017_v3 = vmul.f32 %v999_v49, %v930_v22 }
 0xcba   :  { %v1002_v0 = vmul.f32 %v1242_v50, %v985_v54  ;;  %vm1007_vm10 = vweird.f32 %v1242_v50 }
 0xcbb   :  { %1020 = vrot.lane.b32.xlu0 %v1018_v51, %s1301_s1  ;;  %vm1008_vm13 = vmor %vm1006_vm12, %vm1007_vm10 }
 0xcbc   :  { %v1003_v1 = vsub.f32 1.0, %v1002_v0 }
 0xcbe   :  { %v1004_v2 = vmul.f32 %v1242_v50, %v1003_v1 }
 0xcc0   :  { %v1005_v8 = vadd.f32 %v1242_v50, %v1004_v2 }
 0xcc2   :  { %v1009_v12 = vsel %vm1008_vm13, %v1242_v50, %v1005_v8 }
 0xcc3   :  { %v1014_v15 = vsel %vm1011_vm14, %v1013_v13, %v1009_v12 }
 0xd2d   :  { %v1021_v4 = vpop.permute.xlu0 %1020 }
 0xd2e   :  { %v1023_v6 = vadd.f32 %v1021_v4, %v1017_v3 }
 0xd30   :  { %1243 = vtanh.f32 %v1023_v6 }
 0xd36   :  { %v1244_v14 = vpop.eup %1243 }
 0xd37   :  { %v1025_v16 = vmul.f32 %v1244_v14, %v1014_v15 }
 0xd39   :  { %1030 = vrot.lane.b32.xlu1 %v1025_v16, %s1301_s1 }
 0xdab   :  { %v1031_v58 = vpop.permute.xlu1 %1030 }
 0xdac   :  { %v1034_v59 = vsel %vm1028_vm1, %v1031_v58, %v1578_v31 }
 0xdad   :  { %1044 = vrot.lane.b32.xlu2 %v1034_v59, %s1302_s14 }
 0xe07   :  { %v1045_v55 = vpop.permute.xlu2 %1044 }
 0xe08   :  { %1128 = vmatmul.msk.f32.vlgmr.msrb.gmra.mxu0 %vm1046_vm2, %v1045_v55 }
 0xe85   :  { %v1066_v63 = vpop.f32.mrf.mxu0 }
 0xe86   :  { %v1067_v61 = vadd.f32 %v1136_v60, %v1066_v63 }
 0xe88   :  { %1070 = vst.msk [vmem:[#allocation6] sm:$0x3] %vm1069_vm3, %v1067_v61 }
 0xe89   :  { %1081 = dma.vmem_to_hbm [thread:$0]  %s1077_s17, 32, %s1079_s20, [#allocation5]  }
 0xe8a   :  { %1295 = dma.done.wait [#allocation5], 32  }
 0xe8b   :  { %1296 = vsyncadd [#allocation5], 4294967264 }
 0xe8c   :  { %1086 = vsyncpa [#allocation4], 1 }
 0xe8d   :  { %1087 = vsyncpa [#allocation5], 1 }

</bundles_post_ra>
